<compile_context>
chip_gen: v7x
topology: tpu7x:2x2x1
jax: 0.10.0
libtpu: 0.0.40
codegen_flags: <defaults>
</compile_context>

<pallas_src>
from math import sqrt

import jax
import jax.numpy as jnp
from jax.experimental import pallas as pl
from jax.experimental.pallas import tpu as pltpu


# ---------------------------------------------------------------------------
# Pallas kernel: fused SIREN MLP over one (batch, pixel-tile) block.
#   refs layout: (x_ref, wT0, b0, wT1, b1, ..., wT_out, b_out, o_ref)
#   x_ref : (C_in, tile_m)   activations, pixels on the lane axis
#   wT    : (C_out, C_in)    transposed (omega-folded) weights
#   b     : (C_out, 1)       (omega-folded) bias, broadcasts over lanes
#   Hidden layers apply sin(.), the final layer is linear.
# ---------------------------------------------------------------------------
def siren_kernel(x_ref, *refs, sin_in_bf16=False):
    o_ref = refs[-1]
    param_refs = refs[:-1]
    n_layers = len(param_refs) // 2

    h = x_ref[...].astype(jnp.float32)                   # (C, tile_m)
    for li in range(n_layers):
        wT = param_refs[2 * li][...]                     # (out, in)
        b = param_refs[2 * li + 1][...]                  # (out, 1)
        y = jnp.dot(wT, h, preferred_element_type=jnp.float32) + b
        if li < n_layers - 1:
            if sin_in_bf16:
                # v6e/v7x: bf16 EUP sin ~2x throughput; relax tolerance if used.
                h = jnp.sin(y.astype(jnp.bfloat16)).astype(jnp.float32)
            else:
                h = jnp.sin(y)                           # SirenLayer (omega folded)
        else:
            h = y                                        # output_linear
    o_ref[...] = h.astype(o_ref.dtype)


def siren_forward(x_nchw, params, omega_0, *, tile_m=4096, sin_in_bf16=False):
    """params: list of (W [in,out], b [1,out]) including the output layer."""
    B, C, H, W = x_nchw.shape
    out_ch = params[-1][0].shape[1]
    n_layers = len(params)
    n_pix = H * W

    # NCHW -> (B, C, H*W): free reshape (contiguous collapse of last two dims).
    x3d = x_nchw.reshape(B, C, n_pix).astype(jnp.float32)

    # Tile selection: lane tile must be a multiple of 128 (or equal the full
    # pixel count).  Keep it large to amortize grid-step overhead, but keep
    # enough grid steps to feed both v7x TensorCores.
    if n_pix < 128:
        tile_m = n_pix                                   # full dim, single block
    else:
        tile_m = min(tile_m, (n_pix // 128) * 128)
        tile_m = max(128, (tile_m // 128) * 128)
        while tile_m > 512 and B * pl.cdiv(n_pix, tile_m) < 4:
            tile_m //= 2
    grid = (B, pl.cdiv(n_pix, tile_m))

    # x tile: squeeze batch, channel-major (C, tile_m). Ragged last tile is
    # masked by Pallas, so no explicit padding is needed.
    in_specs = [pl.BlockSpec((pl.Squeezed(), C, tile_m), lambda b, i: (b, 0, i))]
    args = [x3d]
    for li, (w, b) in enumerate(params):
        # Fold omega_0 into hidden-layer weights *and* biases:
        #   sin(omega*(Wx+b)) == sin((omega*W)x + omega*b)
        scale = jnp.float32(omega_0) if li < n_layers - 1 else jnp.float32(1.0)
        wT = jnp.transpose(scale * w)                    # (out, in)
        bT = (scale * b).reshape(-1, 1)                  # (out, 1)
        # Grid-invariant full blocks (tiny; stay resident in VMEM).
        in_specs.append(pl.BlockSpec(wT.shape, lambda b_, i_: (0, 0)))
        in_specs.append(pl.BlockSpec(bT.shape, lambda b_, i_: (0, 0)))
        args.extend([wT, bT])

    kernel = lambda *refs: siren_kernel(*refs, sin_in_bf16=sin_in_bf16)

    out = pl.pallas_call(
        kernel,
        out_shape=jax.ShapeDtypeStruct((B, out_ch, n_pix), jnp.float32),
        grid=grid,
        in_specs=in_specs,
        out_specs=pl.BlockSpec((pl.Squeezed(), out_ch, tile_m),
                               lambda b, i: (b, 0, i)),
        compiler_params=pltpu.CompilerParams(
            dimension_semantics=("parallel", "parallel")),
    )(*args)

    # (B, out_ch, H*W) -> (B, out_ch, H, W): free reshape.
    return out.reshape(B, out_ch, H, W)


# ---------------------------------------------------------------------------
# Deterministic parameter init matching SIRENBase.initialize()
# ---------------------------------------------------------------------------
def init_siren_params(key, data_dim, out_channels, hidden_channels,
                      no_layers, omega_0, bias=True):
    params = []
    dims = [data_dim] + [hidden_channels] * (no_layers - 1)

    # kernel_net layers (SirenLayer): first layer U(-1/in, 1/in),
    # later layers U(-sqrt(6/in)/omega_0, +), bias ~ N(0, 1e-6)
    for li in range(no_layers - 1):
        cin, cout = dims[li], dims[li + 1]
        key, kw, kb = jax.random.split(key, 3)
        if li == 0:
            w_std = 1.0 / cin
        else:
            w_std = sqrt(6.0 / cin) / omega_0
        w = jax.random.uniform(kw, (cin, cout), jnp.float32,
                               minval=-w_std, maxval=w_std)
        if bias:
            b = 1e-6 * jax.random.normal(kb, (1, cout), jnp.float32)
        else:
            b = jnp.zeros((1, cout), jnp.float32)
        params.append((w, b))

    # output_linear: kaiming_uniform(nonlinearity='linear') -> U(-sqrt(3/fan_in), +)
    cin, cout = hidden_channels, out_channels
    key, kw, kb = jax.random.split(key, 3)
    bound = sqrt(3.0 / cin)
    w = jax.random.uniform(kw, (cin, cout), jnp.float32,
                           minval=-bound, maxval=bound)
    if bias:
        b = 1e-6 * jax.random.normal(kb, (1, cout), jnp.float32)
    else:
        b = jnp.zeros((1, cout), jnp.float32)
    params.append((w, b))
    return params


def siren_reference(x_nchw, params, omega_0):
    """Pure-JAX reference of SIRENBase.forward for verification."""
    B, C, H, W = x_nchw.shape
    h = jnp.transpose(x_nchw, (0, 2, 3, 1)).reshape(-1, C).astype(jnp.float32)
    for li, (w, b) in enumerate(params):
        y = h @ w + b
        h = jnp.sin(omega_0 * y) if li < len(params) - 1 else y
    out_ch = params[-1][0].shape[1]
    return jnp.transpose(h.reshape(B, H, W, out_ch), (0, 3, 1, 2))


if __name__ == "__main__":
    # SIRENBase config (small synthetic sizes)
    data_dim = 2          # input coordinate channels
    out_channels = 4
    hidden_channels = 32
    no_layers = 3         # 2 SirenLayers + output_linear
    omega_0 = 30.0
    B, H, W = 2, 16, 16

    key = jax.random.PRNGKey(0)
    key, kx = jax.random.split(key)
    x = jax.random.normal(kx, (B, data_dim, H, W), jnp.float32)

    params = init_siren_params(key, data_dim, out_channels, hidden_channels,
                               no_layers, omega_0, bias=True)

    # TODO(synk): learn_omega_0=True (trainable omega) is a training-time concern;
    # the forward pass here treats omega_0 as a constant folded into the weights.
    out = siren_forward(x, params, omega_0)
    out = jax.block_until_ready(out)

    ref = siren_reference(x, params, omega_0)
    assert out.shape == (B, out_channels, H, W)
    assert jnp.allclose(out, ref, atol=1e-4, rtol=1e-4), "mismatch vs reference"

    print("KERNEL_OK")
</pallas_src>

<mosaic_0001>
module attributes {stable_mosaic.version = 11 : i64} {
  func.func @_lambda_(%arg0: i32, %arg1: i32, %arg2: memref<1x2x256xf32, #tpu.memory_space<vmem>>, %arg3: memref<32x2xf32, #tpu.memory_space<vmem>>, %arg4: memref<32x1xf32, #tpu.memory_space<vmem>>, %arg5: memref<32x32xf32, #tpu.memory_space<vmem>>, %arg6: memref<32x1xf32, #tpu.memory_space<vmem>>, %arg7: memref<4x32xf32, #tpu.memory_space<vmem>>, %arg8: memref<4x1xf32, #tpu.memory_space<vmem>>, %arg9: memref<1x4x256xf32, #tpu.memory_space<vmem>>) attributes {dimension_semantics = [#tpu.dimension_semantics<parallel>, #tpu.dimension_semantics<parallel>], iteration_bounds = array<i64: 2, 1>, scalar_prefetch = 0 : i64, scratch_operands = 0 : i64, tpu.core_type = #tpu.core_type<tc>, window_params = [{transform_indices = @transform_0, window_bounds = array<i64: 1, 2, 256>}, {pipeline_mode = #tpu.pipeline_mode<synchronous>, transform_indices = @transform_1, window_bounds = array<i64: 32, 2>}, {pipeline_mode = #tpu.pipeline_mode<synchronous>, transform_indices = @transform_2, window_bounds = array<i64: 32, 1>}, {pipeline_mode = #tpu.pipeline_mode<synchronous>, transform_indices = @transform_3, window_bounds = array<i64: 32, 32>}, {pipeline_mode = #tpu.pipeline_mode<synchronous>, transform_indices = @transform_4, window_bounds = array<i64: 32, 1>}, {pipeline_mode = #tpu.pipeline_mode<synchronous>, transform_indices = @transform_5, window_bounds = array<i64: 4, 32>}, {pipeline_mode = #tpu.pipeline_mode<synchronous>, transform_indices = @transform_6, window_bounds = array<i64: 4, 1>}, {transform_indices = @transform_7, window_bounds = array<i64: 1, 4, 256>}]} {
    %c0 = arith.constant 0 : index
    %c0_0 = arith.constant 0 : index
    %c0_1 = arith.constant 0 : index
    %0 = vector.load %arg2[%c0, %c0_0, %c0_1] : memref<1x2x256xf32, #tpu.memory_space<vmem>>, vector<1x2x256xf32>
    %1 = vector.shape_cast %0 : vector<1x2x256xf32> to vector<2x256xf32>
    %c0_2 = arith.constant 0 : index
    %c0_3 = arith.constant 0 : index
    %2 = vector.load %arg3[%c0_2, %c0_3] : memref<32x2xf32, #tpu.memory_space<vmem>>, vector<32x2xf32>
    %c0_4 = arith.constant 0 : index
    %c0_5 = arith.constant 0 : index
    %3 = vector.load %arg4[%c0_4, %c0_5] : memref<32x1xf32, #tpu.memory_space<vmem>>, vector<32x1xf32>
    %cst = arith.constant dense<0.000000e+00> : vector<32x256xf32>
    %4 = tpu.matmul %2, %1, %cst {dimension_numbers = #tpu.dot_dimension_numbers<[1], [0], [0], [1], [0, 0, 1, 1], [], []>} : vector<32x2xf32>, vector<2x256xf32>, vector<32x256xf32> -> vector<32x256xf32>
    %5 = vector.broadcast %3 : vector<32x1xf32> to vector<32x256xf32>
    %6 = arith.addf %4, %5 : vector<32x256xf32>
    %7 = math.sin %6 : vector<32x256xf32>
    %c0_6 = arith.constant 0 : index
    %c0_7 = arith.constant 0 : index
    %8 = vector.load %arg5[%c0_6, %c0_7] : memref<32x32xf32, #tpu.memory_space<vmem>>, vector<32x32xf32>
    %c0_8 = arith.constant 0 : index
    %c0_9 = arith.constant 0 : index
    %9 = vector.load %arg6[%c0_8, %c0_9] : memref<32x1xf32, #tpu.memory_space<vmem>>, vector<32x1xf32>
    %cst_10 = arith.constant dense<0.000000e+00> : vector<32x256xf32>
    %10 = tpu.matmul %8, %7, %cst_10 {dimension_numbers = #tpu.dot_dimension_numbers<[1], [0], [0], [1], [0, 0, 1, 1], [], []>} : vector<32x32xf32>, vector<32x256xf32>, vector<32x256xf32> -> vector<32x256xf32>
    %11 = vector.broadcast %9 : vector<32x1xf32> to vector<32x256xf32>
    %12 = arith.addf %10, %11 : vector<32x256xf32>
    %13 = math.sin %12 : vector<32x256xf32>
    %c0_11 = arith.constant 0 : index
    %c0_12 = arith.constant 0 : index
    %14 = vector.load %arg7[%c0_11, %c0_12] : memref<4x32xf32, #tpu.memory_space<vmem>>, vector<4x32xf32>
    %c0_13 = arith.constant 0 : index
    %c0_14 = arith.constant 0 : index
    %15 = vector.load %arg8[%c0_13, %c0_14] : memref<4x1xf32, #tpu.memory_space<vmem>>, vector<4x1xf32>
    %cst_15 = arith.constant dense<0.000000e+00> : vector<4x256xf32>
    %16 = tpu.matmul %14, %13, %cst_15 {dimension_numbers = #tpu.dot_dimension_numbers<[1], [0], [0], [1], [0, 0, 1, 1], [], []>} : vector<4x32xf32>, vector<32x256xf32>, vector<4x256xf32> -> vector<4x256xf32>
    %17 = vector.broadcast %15 : vector<4x1xf32> to vector<4x256xf32>
    %18 = arith.addf %16, %17 : vector<4x256xf32>
    %c0_16 = arith.constant 0 : index
    %c0_17 = arith.constant 0 : index
    %c0_18 = arith.constant 0 : index
    %19 = vector.load %arg9[%c0_16, %c0_17, %c0_18] : memref<1x4x256xf32, #tpu.memory_space<vmem>>, vector<1x4x256xf32>
    %20 = vector.shape_cast %19 : vector<1x4x256xf32> to vector<4x256xf32>
    %21 = vector.shape_cast %18 : vector<4x256xf32> to vector<1x4x256xf32>
    tpu.vector_store %arg9[%c0_16, %c0_17, %c0_18], %21 {strides = array<i32>} : memref<1x4x256xf32, #tpu.memory_space<vmem>>, vector<1x4x256xf32>,
    return
  }
  func.func @transform_0(%arg0: i32, %arg1: i32) -> (i32, i32, i32) {
    %c0_i32 = arith.constant 0 : i32
    %c0_i32_0 = arith.constant 0 : i32
    return %arg0, %c0_i32, %arg1 : i32, i32, i32
  }
  func.func @transform_1(%arg0: i32, %arg1: i32) -> (i32, i32) {
    %c0_i32 = arith.constant 0 : i32
    %c0_i32_0 = arith.constant 0 : i32
    %c0_i32_1 = arith.constant 0 : i32
    return %c0_i32, %c0_i32_0 : i32, i32
  }
  func.func @transform_2(%arg0: i32, %arg1: i32) -> (i32, i32) {
    %c0_i32 = arith.constant 0 : i32
    %c0_i32_0 = arith.constant 0 : i32
    %c0_i32_1 = arith.constant 0 : i32
    return %c0_i32, %c0_i32_0 : i32, i32
  }
  func.func @transform_3(%arg0: i32, %arg1: i32) -> (i32, i32) {
    %c0_i32 = arith.constant 0 : i32
    %c0_i32_0 = arith.constant 0 : i32
    %c0_i32_1 = arith.constant 0 : i32
    return %c0_i32, %c0_i32_0 : i32, i32
  }
  func.func @transform_4(%arg0: i32, %arg1: i32) -> (i32, i32) {
    %c0_i32 = arith.constant 0 : i32
    %c0_i32_0 = arith.constant 0 : i32
    %c0_i32_1 = arith.constant 0 : i32
    return %c0_i32, %c0_i32_0 : i32, i32
  }
  func.func @transform_5(%arg0: i32, %arg1: i32) -> (i32, i32) {
    %c0_i32 = arith.constant 0 : i32
    %c0_i32_0 = arith.constant 0 : i32
    %c0_i32_1 = arith.constant 0 : i32
    return %c0_i32, %c0_i32_0 : i32, i32
  }
  func.func @transform_6(%arg0: i32, %arg1: i32) -> (i32, i32) {
    %c0_i32 = arith.constant 0 : i32
    %c0_i32_0 = arith.constant 0 : i32
    %c0_i32_1 = arith.constant 0 : i32
    return %c0_i32, %c0_i32_0 : i32, i32
  }
  func.func @transform_7(%arg0: i32, %arg1: i32) -> (i32, i32, i32) {
    %c0_i32 = arith.constant 0 : i32
    %c0_i32_0 = arith.constant 0 : i32
    return %arg0, %c0_i32, %arg1 : i32, i32, i32
  }
}

</mosaic_0001>

<bundles_post_ra>
// kernel: tpu_custom_call.1
= control target key start
LH: loop header
LB: loop body
LE: loop exit
PB: predicated region body
PF: predicated region fallthrough
CT: control target
= control target key end

     0   :  { %12 = vsyncpa [#allocation3], 0  ;;  %s4495_s0 = inlined_call_operand.vmem [shape: f32[2,2,256], index: 0, kind: input, shape index: {}]   ;;  %s4496_s1 = inlined_call_operand.vmem [shape: f32[32,2], index: 1, kind: input, shape index: {}]   ;;  %s4497_s2 = inlined_call_operand.vmem [shape: f32[32,1], index: 2, kind: input, shape index: {}]   ;;  %s4498_s3 = inlined_call_operand.vmem [shape: f32[32,32], index: 3, kind: input, shape index: {}]   ;;  %s4499_s4 = inlined_call_operand.vmem [shape: f32[32,1], index: 4, kind: input, shape index: {}]   ;;  %s4500_s5 = inlined_call_operand.vmem [shape: f32[4,32], index: 5, kind: input, shape index: {}]   ;;  %s4501_s6 = inlined_call_operand.vmem [shape: f32[4,1], index: 6, kind: input, shape index: {}]   ;;  %s4502_s7 = inlined_call_operand.hbm [shape: f32[2,4,256], index: 7, kind: output, shape index: {}]  }
   0x1   :  { %14 = vsyncpa [#allocation3 + $0x1], 0  ;;  %s2855_s24 = smov 0   ;;  %s2857_s25 = smov 0  }
   0x2   :  { %s2859_s26 = smov 0   ;;  %s2861_s27 = smov 0  }
   0x3   :  { %s2863_s28 = smov 0   ;;  %s2865_s29 = smov 0  }
   0x4 LB: > { %s2426_s30 = sadd.s32 4294967295, %s2804_s29   ;;  %s2427_s8 = sadd.s32 4294967294, %s2804_s29   ;;  %s2804_s29 = sphi %s2865_s29, %s20_s29   ;;  %s2800_s28 = sphi %s2863_s28, %s4655_s28   ;;  %s2796_s27 = sphi %s2861_s27, %s4654_s27   ;;  %s2792_s26 = sphi %s2859_s26, %s4653_s26   ;;  %s2788_s25 = sphi %s2857_s25, %s4652_s25   ;;  %s2784_s24 = sphi %s2855_s24, %s4651_s24  }
   0x5   : > { %s32_s9 = sadd.s32 1, %s2800_s28  ;;  %s195_s10 = sadd.s32 1, %s2792_s26 }
   0x6   : > { %p34_p0 = scmp.ge.s32.totalorder %s32_s9, 2  ;;  %p205_p1 = scmp.ne.s32.totalorder %s2792_s26, %s2788_s25 }
   0x7   : > { %p206_p2 = scmp.eq.s32.totalorder %s2426_s30, 1  ;;  %p211_p3 = scmp.ne.s32.totalorder %s2788_s25, %s2784_s24 }
   0x8   : > { %s4657_s9 = smov (%p34_p0, %s32_s9), 0  ;;  %p212_p5 = scmp.eq.s32.totalorder %s2427_s8, 1 }
   0x9   : > { %p2895_p4 = por %p206_p2, %p205_p1  ;;  %s190_s12 = ssub.s32 %s2800_s28, %s4657_s9 }
   0xa   : > { %p2430_p6 = scmp.ge.s32.totalorder %s2804_s29, 1  ;;  %p193_p7 = scmp.eq.s32.totalorder %s190_s12, 0 }
   0xb   : > { %p2902_p8 = por %p212_p5, %p211_p3  ;;  %p261_p9 = scmp.lt.s32.totalorder %s2804_s29, 3 }
   0xc   : > { %s2908_s14 = scalar_select %p193_p7, %s2792_s26, %s195_s10  }
   0xd   : > { %p262_p10 = pnand %p2430_p6, %p261_p9 }
   0xf   : > { %265 = sbr.rel (%p262_p10) target bundleno = 1131 (0x46b), region = 48 }
  0x16   : > { %p298_p11 = scmp.lt.s32.totalorder %s2796_s27, 1  ;;  %v4503_v0 = vmov 0.0   ;;  %v313_v1 = vld [vmem:[%s4497_s2] sm:$0xff]  ;;  %v2807_v2 = vmov 0   ;;  %v315_v3 = vld [vmem:[%s4497_s2 + $0x10] sm:$0xff]  ;;  %v314_v4 = vld [vmem:[%s4497_s2 + $0x8] sm:$0xff] }
  0x17   : > { %428 = vmatprep.mubr.f32.mxu0 %v4503_v0  ;;  %1390 = vmatprep.mubr.f32.mxu1 %v4503_v0  ;;  %v316_v5 = vld [vmem:[%s4497_s2 + $0x18] sm:$0xff]  ;;  %vm359_vm0 = vcmask 1041408   ;;  %v309_v8 = vld [vmem:[%s4496_s1] sm:$0xff]  ;;  %vm346_vm1 = vcmask 15360   ;;  %v1290_v10 = vld [vmem:[%s4499_s4 + $0x8] sm:$0xff]  ;;  %s2516_s19 = sshll.u32 %s2796_s27, 7 }
  0x18   : > { %s299_s17 = scalar_select %p298_p11, %s2796_s27, 1  ;;  %2660 = vset.pattern.permute.xlu0 %v2807_v2  ;;  %2661 = vset.pattern.permute.xlu1 %v2807_v2  ;;  %v1289_v9 = vld [vmem:[%s4499_s4] sm:$0xff]  ;;  %v310_v11 = vld [vmem:[%s4496_s1 + $0x8] sm:$0xff]  ;;  %v1291_v12 = vld [vmem:[%s4499_s4 + $0x10] sm:$0xff]  ;;  %v4550_v43 = vmov 683565275  }
  0x19   : > { %319 = vperm.xlu0 %2660, %v313_v1   ;;  %329 = vperm.xlu1 %2661, %v315_v3   ;;  %v1292_v13 = vld [vmem:[%s4499_s4 + $0x18] sm:$0xff]  ;;  %v311_v14 = vld [vmem:[%s4496_s1 + $0x10] sm:$0xff]  ;;  %v2248_v15 = vld [vmem:[%s4501_s6] sm:$0xf]  ;;  %v4515_v45 = vmov 2475754826   ;;  %s4448_s30 = scalar_lea.hbm %s4502_s7, %s2516_s19 }
  0x1a   : > { %s2515_s20 = sshll.u32 %s299_s17, 2  ;;  %v312_v16 = vld [vmem:[%s4496_s1 + $0x18] sm:$0xff]  ;;  %v4513_v49 = vmov 2131351028   ;;  %v4519_v52 = vmov 2102212464  }
  0x1b   : > { %s305_s12 = scalar_lea.vmem %s4495_s0, %s2515_s20  ;;  %v4517_v55 = vmov 920167782   ;;  %v4510_v58 = vmov 1326507024   ;;  %s294_s17 = sand.u32 1, %s2788_s25  }
  0x1c   : > { %v2434_v6 = vld.sshfl [vmem:[%s305_s12] sm:$0x33 pattern:$0x76325410]  ;;  %s2431_s18 = sshll.u32 %s294_s17, 3  ;;  %s2334_s8 = scalar_lea.sflag [#allocation3], %s294_s17 }
  0x1d   : > { %v345_v7 = vcombine.high %v2434_v6, %v2434_v6  ;;  %324 = vperm.xlu0 %2660, %v314_v4   ;;  %334 = vperm.xlu1 %2661, %v316_v5   ;;  %s296_s21 = scalar_lea.vmem [#allocation2], %s2431_s18  ;;  %s2814_s27 = smov [#allocation2]  }
  0x1e   : > { %s2350_s20 = sshll.u32 %s296_s21, 4  ;;  %s2730_s12 = sshll.u32 %s2814_s27, 4  ;;  %s4450_s20 = int_to_ptr.vmem [resolvable:$true] %s2350_s20  ;;  %s2731_s12 = int_to_ptr.vmem [resolvable:$false] %s2730_s12 }
  0x1f   : > { %2435 = vmatprep.subr.msk.mxu0 %vm359_vm0, %v345_v7  ;;  %s2726_s10 = scalar_lea.vmem %s4450_s20, 128  ;;  %s2732_s15 = scalar_lea.vmem %s2731_s12, 256 }
  0x20   : > { %2436 = vmatpush1.msk.msra.mxu0 %vm359_vm0, %v2434_v6  ;;  %p2727_p12 = scmp.ne.s32.totalorder %s4450_s20, %s2726_s10  ;;  %p2733_p1 = scmp.lt.s32.totalorder %s4450_s20, %s2731_s12 }
  0x21   : > { %2437 = vmatmul.mubr.msk.f32.vlgmr.msra.gmra.mrb[0].mxu0 %vm346_vm1, %v309_v8  ;;  %1295 = vperm.xlu0 %2660, %v1289_v9   ;;  %p2734_p2 = scmp.lt.s32.totalorder %s2732_s15, %s2726_s10 }
  0x22   : > { %434 = vmatprep.mubr.f32.mxu0 %v4503_v0  ;;  %1300 = vperm.xlu1 %2661, %v1290_v10   ;;  %p2728_p13 = pnand %p2727_p12, %p2895_p4 }
  0x23   : > { %p2735_p3 = por %p2734_p2, %p2733_p1 }
  0x24   : > { %p2729_p0 = pneg %p2728_p13 }
  0x25   : > { %2438 = vmatmul.mubr.msk.f32.gmra.mrb[2].mxu0 %vm346_vm1, %v310_v11  ;;  %1305 = vperm.xlu0 %2660, %v1291_v12  }
  0x26   : > { %440 = vmatprep.mubr.f32.mxu0 %v4503_v0  ;;  %1310 = vperm.xlu1 %2661, %v1292_v13   ;;  %p2736_p5 = pnand %p2735_p3, %p2729_p0 }
  0x29   : > { %2439 = vmatmul.mubr.msk.f32.gmra.mrb[4].mxu0 %vm346_vm1, %v311_v14  ;;  %2251 = vperm.xlu0 %2660, %v2248_v15  }
  0x2a   : > { %446 = vmatprep.mubr.f32.mxu0 %v4503_v0 }
  0x2d   : > { %2440 = vmatmul.mubr.msk.f32.gmra.mrb[6].mxu0 %vm346_vm1, %v312_v16 }
  0x2e   : > { %2321 = vmatprep.mubr.f32.mxu0 %v4503_v0 }
  0x98   : > { %v320_v17 = vpop.permute.xlu0 %319 }
  0x9c   : > { %v2967_v22 = vpop.permute.xlu0 %324 }
  0xf4   : > { %v430_v18 = vpop.f32.mrb[0].mxu0 }
  0xf5   : > { %v2964_v19 = vadd.f32 %v430_v18, %v320_v17  ;;  %v432_v20 = vpop.f32.mrb[1].mxu0 }
  0xf6   : > { %v2978_v33 = vadd.f32 %v432_v20, %v320_v17 }
  0xf7   : > { %4558 = vst [vmem:[#allocation5_spill] sm:$0xff] %v2964_v19  ;;  %v456_v21 = vand.u32 2139095040, %v2964_v19  ;;  %v4507_v32 = vand.u32 2147483647, %v2964_v19 }
  0xf8   : > { %v436_v23 = vpop.f32.mrb[2].mxu0  ;;  %4560 = vst [vmem:[#allocation7_spill] sm:$0xff] %v2978_v33  ;;  %v560_v41 = vand.u32 2139095040, %v2978_v33 }
  0xf9   : > { %v457_v24 = vshrl.u32 %v456_v21, 23  ;;  %v2970_v25 = vadd.f32 %v436_v23, %v2967_v22  ;;  %v438_v26 = vpop.f32.mrb[3].mxu0  ;;  %v460_v39 = vand.u32 8388607, %v4507_v32 }
  0xfa   : > { %v561_v5 = vshrl.u32 %v560_v41, 23  ;;  %v3013_v23 = vadd.f32 %v438_v26, %v2967_v22 }
  0xfb   : > { %4559 = vst [vmem:[#allocation6_spill] sm:$0xff] %v2970_v25  ;;  %v2441_v27 = vadd.s32 4294967169, %v457_v24  ;;  %v664_v28 = vand.u32 2139095040, %v2970_v25  ;;  %v461_v60 = vor.u32 8388608, %v460_v39  ;;  %v4505_v21 = vand.u32 2147483647, %v2970_v25 }
  0xfc   : > { %v2973_v29 = vpop.f32.mrb[4].mxu0  ;;  %v768_v22 = vand.u32 2139095040, %v3013_v23 }
  0xfd   : > { %v463_v30 = vadd.s32 1, %v2441_v27  ;;  %v2975_v31 = vpop.f32.mrb[5].mxu0  ;;  %v665_v35 = vshrl.u32 %v664_v28, 23  ;;  %v501_v11 = vshll.u32 %v461_v60, 8  ;;  %v668_v39 = vand.u32 8388607, %v4505_v21 }
  0xff   : > { %vm464_vm2 = vcmp.gt.s32.totalorder %v463_v30, 0  ;;  %v2449_v47 = vadd.s32 4294967169, %v665_v35  ;;  %v2445_v35 = vadd.s32 4294967169, %v561_v5 }
 0x100   : > { %v465_v34 = vsel %vm464_vm2, %v463_v30, 0  ;;  %v2980_v36 = vpop.f32.mrb[6].mxu0 }
 0x101   : > { %v467_v37 = vand.u32 31, %v465_v34  ;;  %v2982_v38 = vpop.f32.mrb[7].mxu0  ;;  %v466_v42 = vshrl.u32 %v465_v34, 5  ;;  %v671_v8 = vadd.s32 1, %v2449_v47 }
 0x103   : > { %v468_v40 = vsub.s32 32, %v467_v37  ;;  %v470_v44 = vshll.u32 %v4550_v43, %v467_v37  ;;  %v473_v46 = vshll.u32 %v4515_v45, %v467_v37  ;;  %v476_v51 = vshll.u32 %v4513_v49, %v467_v37 }
 0x104   : > { %v479_v54 = vshll.u32 %v4519_v52, %v467_v37  ;;  %v482_v57 = vshll.u32 %v4517_v55, %v467_v37  ;;  %vm485_vm3 = vcmp.lt.s32.totalorder %v466_v42, 1  ;;  %vm488_vm4 = vcmp.lt.s32.totalorder %v466_v42, 4 }
 0x105   : > { %v471_v48 = vshrl.u32 %v4515_v45, %v468_v40  ;;  %v474_v50 = vshrl.u32 %v4513_v49, %v468_v40  ;;  %v477_v53 = vshrl.u32 %v4519_v52, %v468_v40  ;;  %v480_v56 = vshrl.u32 %v4517_v55, %v468_v40 }
 0x106   : > { %v483_v59 = vshrl.u32 %v4510_v58, %v468_v40  ;;  %vm487_vm5 = vcmp.lt.s32.totalorder %v466_v42, 3  ;;  %vm486_vm6 = vcmp.lt.s32.totalorder %v466_v42, 2  ;;  %v469_v12 = vshrl.u32 %v4550_v43, %v468_v40 }
 0x107   : > { %v472_v61 = vor.u32 %v471_v48, %v470_v44  ;;  %v475_v62 = vor.u32 %v474_v50, %v473_v46  ;;  %v478_v63 = vor.u32 %v477_v53, %v476_v51  ;;  %v481_v1 = vor.u32 %v480_v56, %v479_v54 }
 0x108   : > { %v484_v2 = vor.u32 %v483_v59, %v482_v57  ;;  %vm672_vm7 = vcmp.gt.s32.totalorder %v671_v8, 0  ;;  %v669_v59 = vor.u32 8388608, %v668_v39 }
 0x109   : > { %v493_v3 = vsel %vm485_vm3, %v472_v61, %v475_v62  ;;  %v497_v4 = vsel %vm485_vm3, %v475_v62, %v478_v63  ;;  %v494_v6 = vsel %vm488_vm4, %v481_v1, 920167782  ;;  %v490_v13 = vsel %vm488_vm4, %v478_v63, 2102212464 }
 0x10a   : > { %v498_v7 = vsel %vm488_vm4, %v484_v2, 1326507024  ;;  %v495_v9 = vsel %vm487_vm5, %v478_v63, %v494_v6  ;;  %v489_v24 = vsel %vm485_vm3, %v469_v12, %v472_v61  ;;  %v491_v27 = vsel %vm487_vm5, %v475_v62, %v490_v13  ;;  %v330_v62 = vpop.permute.xlu1 %329 }
 0x10b   : > { %v499_v10 = vsel %vm487_vm5, %v481_v1, %v498_v7  ;;  %v496_v14 = vsel %vm486_vm6, %v493_v3, %v495_v9  ;;  %v673_v28 = vsel %vm672_vm7, %v671_v8, 0  ;;  %v492_v37 = vsel %vm486_vm6, %v489_v24, %v491_v27 }
 0x10c   : > { %v500_v15 = vsel %vm486_vm6, %v497_v4, %v499_v10  ;;  %v3007_v18 = vmul.u32.u64.low %v501_v11, %v496_v14  ;;  %v3008_v20 = vmul.u32.u64.high %v501_v11, %v496_v14, %v3007_v18  ;;  %v675_v30 = vand.u32 31, %v673_v28 }
 0x10d   : > { %v3004_v16 = vmul.u32.u64.low %v501_v11, %v500_v15  ;;  %v3005_v17 = vmul.u32.u64.high %v501_v11, %v500_v15, %v3004_v16  ;;  %v3024_v26 = vshrl.u32 %v673_v28, 5  ;;  %v508_v57 = vmul.u32 %v501_v11, %v492_v37 }
 0x10e   : > { %v511_v34 = vadd.s32 1, %v3008_v20  ;;  %v676_v40 = vsub.s32 32, %v675_v30  ;;  %v678_v41 = vshll.u32 %v4550_v43, %v675_v30  ;;  %v681_v44 = vshll.u32 %v4515_v45, %v675_v30 }
 0x10f   : > { %vm510_vm8 = vc.u32 %v3005_v17, %v3007_v18  ;;  %v684_v46 = vshll.u32 %v4513_v49, %v675_v30  ;;  %v687_v50 = vshll.u32 %v4519_v52, %v675_v30  ;;  %v690_v54 = vshll.u32 %v4517_v55, %v675_v30 }
 0x110   : > { %v512_v47 = vsel %vm510_vm8, %v511_v34, %v3008_v20  ;;  %v679_v48 = vshrl.u32 %v4515_v45, %v676_v40  ;;  %v682_v42 = vshrl.u32 %v4513_v49, %v676_v40  ;;  %v685_v51 = vshrl.u32 %v4519_v52, %v676_v40 }
 0x111   : > { %v688_v53 = vshrl.u32 %v4517_v55, %v676_v40  ;;  %v691_v56 = vshrl.u32 %v4510_v58, %v676_v40  ;;  %vm693_vm9 = vcmp.lt.s32.totalorder %v3024_v26, 1  ;;  %v513_v3 = vadd.s32 %v512_v47, %v508_v57 }
 0x112   : > { %v680_v60 = vor.u32 %v679_v48, %v678_v41  ;;  %v683_v61 = vor.u32 %v682_v42, %v681_v44  ;;  %v686_v63 = vor.u32 %v685_v51, %v684_v46  ;;  %vm696_vm10 = vcmp.lt.s32.totalorder %v3024_v26, 4 }
 0x113   : > { %v689_v1 = vor.u32 %v688_v53, %v687_v50  ;;  %v692_v2 = vor.u32 %v691_v56, %v690_v54  ;;  %v3042_v5 = vadd.f32 %v2973_v29, %v330_v62  ;;  %vm695_vm11 = vcmp.lt.s32.totalorder %v3024_v26, 3 }
 0x114   : > { %v701_v4 = vsel %vm693_vm9, %v680_v60, %v683_v61  ;;  %v705_v7 = vsel %vm693_vm9, %v683_v61, %v686_v63  ;;  %v567_v9 = vadd.s32 1, %v2445_v35  ;;  %vm694_vm12 = vcmp.lt.s32.totalorder %v3024_v26, 2 }
 0x115   : > { %4561 = vst [vmem:[#allocation8_spill] sm:$0xff] %v3042_v5  ;;  %v702_v6 = vsel %vm696_vm10, %v689_v1, 920167782  ;;  %v706_v8 = vsel %vm696_vm10, %v692_v2, 1326507024  ;;  %v709_v13 = vshll.u32 %v669_v59, 8  ;;  %v677_v39 = vshrl.u32 %v4550_v43, %v676_v40 }
 0x116   : > { %v703_v10 = vsel %vm695_vm11, %v686_v63, %v702_v6  ;;  %v707_v29 = vsel %vm695_vm11, %v689_v1, %v706_v8  ;;  %v514_v14 = vadd.s32 536870912, %v513_v3  ;;  %v769_v20 = vshrl.u32 %v768_v22, 23 }
 0x117   : > { %v704_v11 = vsel %vm694_vm12, %v701_v4, %v703_v10  ;;  %v708_v12 = vsel %vm694_vm12, %v705_v7, %v707_v29  ;;  %vm568_vm13 = vcmp.gt.s32.totalorder %v567_v9, 0  ;;  %v872_v28 = vand.u32 2139095040, %v3042_v5 }
 0x118   : > { %v3060_v15 = vmul.u32.u64.low %v709_v13, %v704_v11  ;;  %v3061_v16 = vmul.u32.u64.high %v709_v13, %v704_v11, %v3060_v15  ;;  %v3064_v24 = vmul.u32.u64.low %v709_v13, %v708_v12  ;;  %v3065_v27 = vmul.u32.u64.high %v709_v13, %v708_v12, %v3064_v24 }
 0x119   : > { %v3068_v30 = vshrl.u32 %v514_v14, 30  ;;  %v3070_v34 = vsel %vm568_vm13, %v567_v9, 0  ;;  %v698_v35 = vsel %vm696_vm10, %v686_v63, 2102212464  ;;  %v873_v37 = vshrl.u32 %v872_v28, 23 }
 0x11a   : > { %v2453_v41 = vadd.s32 4294967169, %v769_v20  ;;  %v3076_v44 = vadd.f32 %v2975_v31, %v330_v62  ;;  %v3079_v46 = vand.u32 31, %v3070_v34  ;;  %v697_v47 = vsel %vm693_vm9, %v677_v39, %v680_v60  ;;  %v3129_v39 = vpop.permute.xlu1 %334 }
 0x11b   : > { %4562 = vst [vmem:[#allocation9_spill] sm:$0xff] %v3068_v30  ;;  %v2457_v22 = vadd.s32 4294967169, %v873_v37  ;;  %v699_v48 = vsel %vm695_vm11, %v683_v61, %v698_v35  ;;  %v516_v42 = vshll.u32 %v3068_v30, 30  ;;  %v719_v50 = vadd.s32 1, %v3061_v16 }
 0x11c   : > { %4563 = vst [vmem:[#allocation10_spill] sm:$0xff] %v3076_v44  ;;  %vm718_vm14 = vc.u32 %v3065_v27, %v3060_v15  ;;  %v775_v31 = vadd.s32 1, %v2453_v41  ;;  %v976_v40 = vand.u32 2139095040, %v3076_v44  ;;  %v700_v53 = vsel %vm694_vm12, %v697_v47, %v699_v48 }
 0x11d   : > { %v879_v51 = vadd.s32 1, %v2457_v22  ;;  %v3093_v54 = vsub.s32 32, %v3079_v46  ;;  %v3095_v56 = vsub.s32 %v513_v3, %v516_v42  ;;  %v720_v57 = vsel %vm718_vm14, %v719_v50, %v3061_v16 }
 0x11e   : > { %v4509_v59 = vand.u32 2147483647, %v3042_v5  ;;  %v716_v61 = vmul.u32 %v709_v13, %v700_v53  ;;  %vm776_vm0 = vcmp.gt.s32.totalorder %v775_v31, 0  ;;  %v977_v62 = vshrl.u32 %v976_v40, 23 }
 0x11f   : > { %vm880_vm15 = vcmp.gt.s32.totalorder %v879_v51, 0  ;;  %v4506_v1 = vand.u32 2147483647, %v2978_v33  ;;  %v3102_v26 = vshll.u32 %v4519_v52, %v3079_v46  ;;  %v3106_v2 = vshrl.u32 %v4517_v55, %v3093_v54 }
 0x120   : > { %v881_v60 = vsel %vm880_vm15, %v879_v51, 0  ;;  %v3110_v3 = vshrl.u32 %v4510_v58, %v3093_v54  ;;  %v3112_v4 = vadd.s32 %v720_v57, %v716_v61  ;;  %v519_v6 = vsub.s32 0, %v3095_v56 }
 0x121   : > { %v883_v63 = vand.u32 31, %v881_v60  ;;  %v3115_v7 = vsel %vm776_vm0, %v775_v31, 0  ;;  %v876_v8 = vand.u32 8388607, %v4509_v59  ;;  %v882_v10 = vshrl.u32 %v881_v60, 5 }
 0x122   : > { %v2461_v12 = vadd.s32 4294967169, %v977_v62  ;;  %v722_v24 = vadd.s32 536870912, %v3112_v4  ;;  %v3133_v42 = vmin.u32 %v519_v6, %v3095_v56  ;;  %v4508_v51 = vand.u32 2147483647, %v3076_v44 }
 0x123   : > { %v884_v9 = vsub.s32 32, %v883_v63  ;;  %v886_v29 = vshll.u32 %v4550_v43, %v883_v63  ;;  %v889_v11 = vshll.u32 %v4515_v45, %v883_v63  ;;  %v892_v16 = vshll.u32 %v4513_v49, %v883_v63 }
 0x124   : > { %v895_v28 = vshll.u32 %v4519_v52, %v883_v63  ;;  %v898_v37 = vshll.u32 %v4517_v55, %v883_v63  ;;  %v3138_v31 = vadd.f32 %v2980_v36, %v3129_v39  ;;  %v877_v40 = vor.u32 8388608, %v876_v8 }
 0x125   : > { %v887_v13 = vshrl.u32 %v4515_v45, %v884_v9  ;;  %v890_v14 = vshrl.u32 %v4513_v49, %v884_v9  ;;  %v893_v20 = vshrl.u32 %v4519_v52, %v884_v9  ;;  %v896_v35 = vshrl.u32 %v4517_v55, %v884_v9 }
 0x126   : > { %v899_v48 = vshrl.u32 %v4510_v58, %v884_v9  ;;  %4564 = vst [vmem:[#allocation11_spill] sm:$0xff] %v3138_v31  ;;  %vm901_vm1 = vcmp.lt.s32.totalorder %v882_v10, 1  ;;  %v983_v57 = vadd.s32 1, %v2461_v12  ;;  %v3140_v60 = vshrl.u32 %v722_v24, 30 }
 0x127   : > { %v888_v41 = vor.u32 %v887_v13, %v886_v29  ;;  %v891_v22 = vor.u32 %v890_v14, %v889_v11  ;;  %v894_v47 = vor.u32 %v893_v20, %v892_v16  ;;  %v897_v50 = vor.u32 %v896_v35, %v895_v28 }
 0x128   : > { %v900_v53 = vor.u32 %v899_v48, %v898_v37  ;;  %4565 = vst [vmem:[#allocation12_spill] sm:$0xff] %v3140_v60  ;;  %vm903_vm2 = vcmp.lt.s32.totalorder %v882_v10, 3  ;;  %vm904_vm3 = vcmp.lt.s32.totalorder %v882_v10, 4  ;;  %v885_v11 = vshrl.u32 %v4550_v43, %v884_v9 }
 0x129   : > { %v909_v61 = vsel %vm901_vm1, %v888_v41, %v891_v22  ;;  %v906_v62 = vsel %vm904_vm3, %v894_v47, 2102212464  ;;  %v910_v63 = vsel %vm904_vm3, %v897_v50, 920167782  ;;  %v913_v6 = vsel %vm901_vm1, %v891_v22, %v894_v47 }
 0x12a   : > { %v914_v29 = vsel %vm904_vm3, %v900_v53, 1326507024  ;;  %vm902_vm4 = vcmp.lt.s32.totalorder %v882_v10, 2  ;;  %v911_v36 = vsel %vm903_vm2, %v894_v47, %v910_v63  ;;  %v1080_v8 = vand.u32 2139095040, %v3138_v31 }
 0x12b   : > { %v912_v12 = vsel %vm902_vm4, %v909_v61, %v911_v36  ;;  %v915_v13 = vsel %vm903_vm2, %v897_v50, %v914_v29  ;;  %v917_v14 = vshll.u32 %v877_v40, 8  ;;  %vm984_vm5 = vcmp.gt.s32.totalorder %v983_v57, 0 }
 0x12c   : > { %v905_v16 = vsel %vm901_vm1, %v885_v11, %v888_v41  ;;  %v907_v20 = vsel %vm903_vm2, %v891_v22, %v906_v62  ;;  %v916_v24 = vsel %vm902_vm4, %v913_v6, %v915_v13  ;;  %v980_v9 = vand.u32 8388607, %v4508_v51 }
 0x12d   : > { %v3154_v28 = vmul.u32.u64.low %v917_v14, %v916_v24  ;;  %v3155_v35 = vmul.u32.u64.high %v917_v14, %v916_v24, %v3154_v28  ;;  %v3157_v37 = vmul.u32.u64.low %v917_v14, %v912_v12  ;;  %v3158_v47 = vmul.u32.u64.high %v917_v14, %v912_v12, %v3157_v37 }
 0x12e   : > { %v3163_v48 = vshll.u32 %v4517_v55, %v3079_v46  ;;  %v724_v41 = vshll.u32 %v3140_v60, 30  ;;  %v985_v50 = vsel %vm984_vm5, %v983_v57, 0  ;;  %v1081_v22 = vshrl.u32 %v1080_v8, 23 }
 0x12f   : > { %v3167_v40 = vshrl.u32 %v3070_v34, 5  ;;  %v908_v53 = vsel %vm902_vm4, %v905_v16, %v907_v20  ;;  %v987_v61 = vand.u32 31, %v985_v50  ;;  %v3172_v62 = vand.u32 8388607, %v4506_v1 }
 0x130   : > { %v521_v63 = vclz %v3133_v42  ;;  %v3177_v6 = vor.u32 %v3106_v2, %v3102_v26  ;;  %v588_v57 = vor.u32 %v3110_v3, %v3163_v48  ;;  %v3182_v29 = vand.u32 31, %v3115_v7 }
 0x131   : > { %vm926_vm6 = vc.u32 %v3155_v35, %v3157_v37  ;;  %v927_v34 = vadd.s32 1, %v3158_v47  ;;  %v981_v10 = vor.u32 8388608, %v980_v9  ;;  %v988_v11 = vsub.s32 32, %v987_v61 }
 0x132   : > { %v3188_v36 = vsub.s32 %v3112_v4, %v724_v41  ;;  %v924_v8 = vmul.u32 %v917_v14, %v908_v53  ;;  %v990_v26 = vshll.u32 %v4550_v43, %v987_v61  ;;  %v2465_v2 = vadd.s32 4294967169, %v1081_v22 }
 0x133   : > { %v928_v12 = vsel %vm926_vm6, %v927_v34, %v3158_v47  ;;  %v991_v3 = vshrl.u32 %v4515_v45, %v988_v11  ;;  %v993_v13 = vshll.u32 %v4515_v45, %v987_v61  ;;  %v994_v16 = vshrl.u32 %v4513_v49, %v988_v11 }
 0x134   : > { %4566 = vst [vmem:[#allocation13_spill] sm:$0xff] %v3188_v36  ;;  %v929_v20 = vadd.s32 %v928_v12, %v924_v8  ;;  %v986_v24 = vshrl.u32 %v985_v50, 5  ;;  %v996_v9 = vshll.u32 %v4513_v49, %v987_v61  ;;  %v997_v28 = vshrl.u32 %v4519_v52, %v988_v11 }
 0x135   : > { %v992_v4 = vor.u32 %v991_v3, %v990_v26  ;;  %v995_v48 = vor.u32 %v994_v16, %v993_v13  ;;  %v999_v14 = vshll.u32 %v4519_v52, %v987_v61  ;;  %v1000_v41 = vshrl.u32 %v4517_v55, %v988_v11 }
 0x136   : > { %v930_v22 = vadd.s32 536870912, %v929_v20  ;;  %v998_v47 = vor.u32 %v997_v28, %v996_v9  ;;  %v1021_v53 = vshll.u32 %v981_v10, 8  ;;  %v4512_v34 = vand.u32 2147483647, %v3138_v31 }
 0x137   : > { %v727_v0 = vsub.s32 0, %v3188_v36  ;;  %v1001_v21 = vor.u32 %v1000_v41, %v999_v14  ;;  %v1002_v50 = vshll.u32 %v4517_v55, %v987_v61  ;;  %v1003_v8 = vshrl.u32 %v4510_v58, %v988_v11 }
 0x138   : > { %v3203_v12 = vshrl.u32 %v930_v22, 30  ;;  %vm1005_vm7 = vcmp.lt.s32.totalorder %v986_v24, 1  ;;  %vm1008_vm8 = vcmp.lt.s32.totalorder %v986_v24, 4  ;;  %v1087_v26 = vadd.s32 1, %v2465_v2 }
 0x139   : > { %v989_v3 = vshrl.u32 %v4550_v43, %v988_v11  ;;  %v1004_v13 = vor.u32 %v1003_v8, %v1002_v50  ;;  %v1010_v16 = vsel %vm1008_vm8, %v998_v47, 2102212464  ;;  %v1013_v9 = vsel %vm1005_vm7, %v992_v4, %v995_v48 }
 0x13a   : > { %4567 = vst [vmem:[#allocation14_spill] sm:$0xff] %v3203_v12  ;;  %v932_v10 = vshll.u32 %v3203_v12, 30  ;;  %vm1006_vm9 = vcmp.lt.s32.totalorder %v986_v24, 2  ;;  %vm1007_vm10 = vcmp.lt.s32.totalorder %v986_v24, 3  ;;  %v1014_v28 = vsel %vm1008_vm8, %v1001_v21, 920167782 }
 0x13b   : > { %v1009_v14 = vsel %vm1005_vm7, %v989_v3, %v992_v4  ;;  %v1015_v41 = vsel %vm1007_vm10, %v998_v47, %v1014_v28  ;;  %v1017_v61 = vsel %vm1005_vm7, %v995_v48, %v998_v47  ;;  %v1018_v1 = vsel %vm1008_vm8, %v1004_v13, 1326507024 }
 0x13c   : > { %v3207_v32 = vsub.s32 %v929_v20, %v932_v10  ;;  %v1011_v22 = vsel %vm1007_vm10, %v995_v48, %v1010_v16  ;;  %v1016_v51 = vsel %vm1006_vm9, %v1013_v9, %v1015_v41  ;;  %v1019_v2 = vsel %vm1007_vm10, %v1001_v21, %v1018_v1 }
 0x13d   : > { %v1020_v11 = vsel %vm1006_vm9, %v1017_v61, %v1019_v2  ;;  %v3211_v50 = vmul.u32.u64.low %v1021_v53, %v1016_v51  ;;  %v3212_v8 = vmul.u32.u64.high %v1021_v53, %v1016_v51, %v3211_v50  ;;  %vm1088_vm11 = vcmp.gt.s32.totalorder %v1087_v26, 0 }
 0x13e   : > { %v2450_v59 = vmin.u32 %v727_v0, %v3188_v36  ;;  %v3216_v58 = vmul.u32.u64.low %v1021_v53, %v1020_v11  ;;  %v3217_v4 = vmul.u32.u64.high %v1021_v53, %v1020_v11, %v3216_v58  ;;  %v1089_v47 = vsel %vm1088_vm11, %v1087_v26, 0 }
 0x13f   : > { %vm592_vm12 = vcmp.lt.s32.totalorder %v3167_v40, 4  ;;  %v1012_v20 = vsel %vm1006_vm9, %v1009_v14, %v1011_v22  ;;  %v1084_v21 = vand.u32 8388607, %v4512_v34  ;;  %v1091_v1 = vand.u32 31, %v1089_v47 }
 0x140   : > { %v3226_v51 = vsel %vm592_vm12, %v3177_v6, 920167782  ;;  %v3230_v0 = vsel %vm592_vm12, %v588_v57, 1326507024  ;;  %v935_v58 = vsub.s32 0, %v3207_v32  ;;  %v3236_v24 = vadd.s32 4294967294, %v521_v63 }
 0x141   : > { %v3239_v26 = vsub.s32 32, %v3182_v29  ;;  %v1031_v3 = vadd.s32 1, %v3212_v8  ;;  %v1092_v13 = vsub.s32 32, %v1091_v1  ;;  %v729_v16 = vclz %v2450_v59 }
 0x142   : > { %v1028_v9 = vmul.u32 %v1021_v53, %v1012_v20  ;;  %vm1030_vm13 = vc.u32 %v3217_v4, %v3211_v50  ;;  %v3246_v57 = vadd.f32 %v2982_v38, %v3129_v39  ;;  %v1085_v42 = vor.u32 8388608, %v1084_v21 }
 0x143   : > { %v1032_v10 = vsel %vm1030_vm13, %v1031_v3, %v3212_v8  ;;  %v1095_v63 = vshrl.u32 %v4515_v45, %v1092_v13  ;;  %v1098_v28 = vshrl.u32 %v4513_v49, %v1092_v13  ;;  %v2458_v14 = vmin.u32 %v935_v58, %v3207_v32 }
 0x144   : > { %4568 = vst [vmem:[#allocation15_spill] sm:$0xff] %v3246_v57  ;;  %v1033_v41 = vadd.s32 %v1032_v10, %v1028_v9  ;;  %v1094_v59 = vshll.u32 %v4550_v43, %v1091_v1  ;;  %v1101_v53 = vshrl.u32 %v4519_v52, %v1092_v13  ;;  %v1097_v61 = vshll.u32 %v4515_v45, %v1091_v1 }
 0x145   : > { %v1100_v22 = vshll.u32 %v4513_v49, %v1091_v1  ;;  %v1103_v38 = vshll.u32 %v4519_v52, %v1091_v1  ;;  %v1104_v39 = vshrl.u32 %v4517_v55, %v1092_v13  ;;  %v1090_v11 = vshrl.u32 %v1089_v47, 5 }
 0x146   : > { %v1034_v2 = vadd.s32 536870912, %v1033_v41  ;;  %v1096_v8 = vor.u32 %v1095_v63, %v1094_v59  ;;  %v4569_v20 = vmov 1326507024   ;;  %v1099_v3 = vor.u32 %v1098_v28, %v1097_v61 }
 0x147   : > { %v1107_v21 = vshrl.u32 %v4569_v20, %v1092_v13  ;;  %v1102_v58 = vor.u32 %v1101_v53, %v1100_v22  ;;  %v1105_v9 = vor.u32 %v1104_v39, %v1103_v38  ;;  %v1106_v10 = vshll.u32 %v4517_v55, %v1091_v1 }
 0x148   : > { %v3262_v34 = vadd.s32 %v3007_v18, %v3005_v17  ;;  %v3265_v48 = vshrl.u32 %v3115_v7, 5  ;;  %v792_v49 = vshrl.u32 %v4517_v55, %v3239_v26  ;;  %v937_v45 = vclz %v2458_v14 }
 0x149   : > { %vm2444_vm14 = vcmp.lt.s32.totalorder %v3236_v24, 0  ;;  %v795_v47 = vshrl.u32 %v4569_v20, %v3239_v26  ;;  %v1108_v63 = vor.u32 %v1107_v21, %v1106_v10  ;;  %v1184_v28 = vand.u32 2139095040, %v3246_v57 }
 0x14a   : > { %v2451_v1 = vadd.s32 4294967294, %v729_v16  ;;  %v3273_v59 = vshrl.u32 %v1034_v2, 30  ;;  %vm1109_vm15 = vcmp.lt.s32.totalorder %v1090_v11, 1  ;;  %vm1112_vm0 = vcmp.lt.s32.totalorder %v1090_v11, 4 }
 0x14b   : > { %v1114_v17 = vsel %vm1112_vm0, %v1102_v58, 2102212464  ;;  %v1117_v18 = vsel %vm1109_vm15, %v1096_v8, %v1099_v3  ;;  %v1118_v7 = vsel %vm1112_vm0, %v1105_v9, 920167782  ;;  %v1125_v53 = vshll.u32 %v1085_v42, 8 }
 0x14c   : > { %4570 = vst [vmem:[#allocation16_spill] sm:$0xff] %v3273_v59  ;;  %v2459_v61 = vadd.s32 4294967294, %v937_v45  ;;  %v1093_v14 = vshrl.u32 %v4550_v43, %v1092_v13  ;;  %vm1110_vm1 = vcmp.lt.s32.totalorder %v1090_v11, 2  ;;  %vm1111_vm2 = vcmp.lt.s32.totalorder %v1090_v11, 3 }
 0x14d   : > { %v1119_v22 = vsel %vm1111_vm2, %v1102_v58, %v1118_v7  ;;  %v1121_v38 = vsel %vm1109_vm15, %v1099_v3, %v1102_v58  ;;  %v1122_v39 = vsel %vm1112_vm0, %v1108_v63, 1326507024  ;;  %v1185_v21 = vshrl.u32 %v1184_v28, 23 }
 0x14e   : > { %v1036_v10 = vshll.u32 %v3273_v59, 30  ;;  %v1113_v16 = vsel %vm1109_vm15, %v1093_v14, %v1096_v8  ;;  %v1115_v2 = vsel %vm1111_vm2, %v1099_v3, %v1114_v17  ;;  %v1120_v55 = vsel %vm1110_vm1, %v1117_v18, %v1119_v22 }
 0x14f   : > { %v1123_v52 = vsel %vm1111_vm2, %v1105_v9, %v1122_v39  ;;  %v3278_v12 = vmul.u32.u64.low %v1125_v53, %v1120_v55  ;;  %v3279_v60 = vmul.u32.u64.high %v1125_v53, %v1120_v55, %v3278_v12  ;;  %v2469_v45 = vadd.s32 4294967169, %v1185_v21 }
 0x150   : > { %v4572_v13 = vmov 2102212464   ;;  %v4573_v7 = vmov 920167782   ;;  %vm800_vm3 = vcmp.lt.s32.totalorder %v3265_v48, 4  ;;  %v1124_v63 = vsel %vm1110_vm1, %v1121_v38, %v1123_v52 }
 0x151   : > { %4571 = vst [vmem:[#allocation17_spill] sm:$0xff] %v3278_v12  ;;  %v791_v42 = vshll.u32 %v4572_v13, %v3182_v29  ;;  %v794_v58 = vshll.u32 %v4573_v7, %v3182_v29  ;;  %v3291_v8 = vsel %vm2444_vm14, 0, %v3236_v24  ;;  %v1191_v9 = vadd.s32 1, %v2469_v45 }
 0x152   : > { %4574 = vst [vmem:[#allocation18_spill] sm:$0xff] %v3291_v8  ;;  %v3293_v3 = vmul.u32.u64.low %v1125_v53, %v1124_v63  ;;  %v3294_v55 = vmul.u32.u64.high %v1125_v53, %v1124_v63, %v3293_v3  ;;  %v3298_v18 = vsub.s32 %v1033_v41, %v1036_v10  ;;  %v1116_v14 = vsel %vm1110_vm1, %v1113_v16, %v1115_v2 }
 0x153   : > { %v3296_v28 = vor.u32 %v792_v49, %v791_v42  ;;  %v796_v17 = vor.u32 %v795_v47, %v794_v58  ;;  %vm2452_vm4 = vcmp.lt.s32.totalorder %v2451_v1, 0  ;;  %vm2460_vm5 = vcmp.lt.s32.totalorder %v2459_v61, 0 }
 0x154   : > { %4575 = vst [vmem:[#allocation19_spill] sm:$0xff] %v3294_v55  ;;  %v1135_v52 = vadd.s32 1, %v3279_v60  ;;  %vm1192_vm6 = vcmp.gt.s32.totalorder %v1191_v9, 0  ;;  %v525_v22 = vsub.s32 32, %v3291_v8  ;;  %v3305_v24 = vadd.s32 %v3060_v15, %v3065_v27 }
 0x155   : > { %v4525_v38 = vand.u32 2147483647, %v3246_v57  ;;  %v1193_v49 = vsel %vm1192_vm6, %v1191_v9, 0  ;;  %v529_v47 = vsub.s32 4294967266, %v3291_v8  ;;  %v1132_v41 = vmul.u32 %v1125_v53, %v1116_v14 }
 0x156   : > { %vm1134_vm7 = vc.u32 %v3294_v55, %v3278_v12  ;;  %v1195_v11 = vand.u32 31, %v1193_v49  ;;  %v3311_v39 = vsel %vm2452_vm4, 0, %v2451_v1  ;;  %v3313_v21 = vsel %vm2460_vm5, 0, %v2459_v61 }
 0x157   : > { %v1039_v10 = vsub.s32 0, %v3298_v18  ;;  %v1136_v16 = vsel %vm1134_vm7, %v1135_v52, %v3279_v60  ;;  %v3320_v15 = vsel %vm800_vm3, %v3296_v28, 920167782  ;;  %v3324_v27 = vsel %vm800_vm3, %v796_v17, 1326507024 }
 0x158   : > { %v1137_v53 = vadd.s32 %v1136_v16, %v1132_v41  ;;  %v1196_v2 = vsub.s32 32, %v1195_v11  ;;  %v3329_v61 = vshrl.u32 %v3262_v34, %v525_v22  ;;  %v1188_v60 = vand.u32 8388607, %v4525_v38 }
 0x159   : > { %v3335_v45 = vshrl.u32 %v4550_v43, %v3093_v54  ;;  %v3337_v42 = vadd.s32 127, %v529_v47  ;;  %v737_v58 = vsub.s32 4294967266, %v3311_v39  ;;  %v3342_v63 = vadd.s32 %v3157_v37, %v3155_v35 }
 0x15a   : > { %4576 = vst [vmem:[#allocation20_spill] sm:$0xff] %v3329_v61  ;;  %v945_v3 = vsub.s32 4294967266, %v3313_v21  ;;  %v2462_v34 = vmin.u32 %v1039_v10, %v3298_v18  ;;  %v1138_v9 = vadd.s32 536870912, %v1137_v53  ;;  %v1198_v17 = vshll.u32 %v4550_v43, %v1195_v11 }
 0x15b   : > { %v4577_v14 = vmov 2475754826   ;;  %v4578_v41 = vmov 2131351028   ;;  %v1205_v38 = vshrl.u32 %v4572_v13, %v1196_v2  ;;  %v1189_v1 = vor.u32 8388608, %v1188_v60 }
 0x15c   : > { %v1199_v52 = vshrl.u32 %v4577_v14, %v1196_v2  ;;  %v1201_v22 = vshll.u32 %v4577_v14, %v1195_v11  ;;  %v1202_v47 = vshrl.u32 %v4578_v41, %v1196_v2  ;;  %v1204_v16 = vshll.u32 %v4578_v41, %v1195_v11 }
 0x15d   : > { %v1194_v35 = vshrl.u32 %v1193_v49, 5  ;;  %v574_v59 = vshll.u32 %v4550_v43, %v3079_v46  ;;  %v1207_v33 = vshll.u32 %v4572_v13, %v1195_v11  ;;  %v1208_v31 = vshrl.u32 %v4573_v7, %v1196_v2 }
 0x15e   : > { %v1200_v37 = vor.u32 %v1199_v52, %v1198_v17  ;;  %v1203_v10 = vor.u32 %v1202_v47, %v1201_v22  ;;  %v1206_v57 = vor.u32 %v1205_v38, %v1204_v16  ;;  %v941_v30 = vsub.s32 32, %v3313_v21 }
 0x15f   : > { %v946_v25 = vadd.s32 127, %v945_v3  ;;  %v1210_v19 = vshll.u32 %v4573_v7, %v1195_v11  ;;  %v1211_v12 = vshrl.u32 %v4569_v20, %v1196_v2  ;;  %v1041_v55 = vclz %v2462_v34 }
 0x160   : > { %v3359_v60 = vshrl.u32 %v1138_v9, 30  ;;  %v1209_v49 = vor.u32 %v1208_v31, %v1207_v33  ;;  %v575_v17 = vshrl.u32 %v4577_v14, %v3093_v54  ;;  %vm1213_vm8 = vcmp.lt.s32.totalorder %v1194_v35, 1 }
 0x161   : > { %v1212_v52 = vor.u32 %v1211_v12, %v1210_v19  ;;  %vm1216_vm9 = vcmp.lt.s32.totalorder %v1194_v35, 4  ;;  %v1229_v38 = vshll.u32 %v1189_v1, 8  ;;  %v1221_v47 = vsel %vm1213_vm8, %v1200_v37, %v1203_v10 }
 0x162   : > { %v1218_v22 = vsel %vm1216_vm9, %v1206_v57, 2102212464  ;;  %v577_v3 = vshll.u32 %v4577_v14, %v3079_v46  ;;  %v578_v11 = vshrl.u32 %v4578_v41, %v3093_v54  ;;  %v1197_v34 = vshrl.u32 %v4550_v43, %v1196_v2 }
 0x163   : > { %vm1215_vm10 = vcmp.lt.s32.totalorder %v1194_v35, 3  ;;  %v1222_v9 = vsel %vm1216_vm9, %v1209_v49, 920167782  ;;  %v1225_v33 = vsel %vm1213_vm8, %v1203_v10, %v1206_v57  ;;  %v1140_v31 = vshll.u32 %v3359_v60, 30 }
 0x164   : > { %vm1214_vm11 = vcmp.lt.s32.totalorder %v1194_v35, 2  ;;  %v1223_v19 = vsel %vm1215_vm10, %v1206_v57, %v1222_v9  ;;  %v1226_v12 = vsel %vm1216_vm9, %v1212_v52, 1326507024  ;;  %v1217_v16 = vsel %vm1213_vm8, %v1197_v34, %v1200_v37 }
 0x165   : > { %v1219_v1 = vsel %vm1215_vm10, %v1203_v10, %v1218_v22  ;;  %v1224_v20 = vsel %vm1214_vm11, %v1221_v47, %v1223_v19  ;;  %v1227_v7 = vsel %vm1215_vm10, %v1209_v49, %v1226_v12  ;;  %v2463_v44 = vadd.s32 4294967294, %v1041_v55 }
 0x166   : > { %v1228_v5 = vsel %vm1214_vm11, %v1225_v33, %v1227_v7  ;;  %v3369_v36 = vmul.u32.u64.low %v1229_v38, %v1224_v20  ;;  %v3370_v61 = vmul.u32.u64.high %v1229_v38, %v1224_v20, %v3369_v36  ;;  %v580_v43 = vshll.u32 %v4578_v41, %v3079_v46 }
 0x167   : > { %v3373_v8 = vmul.u32.u64.low %v1229_v38, %v1228_v5  ;;  %v3374_v2 = vmul.u32.u64.high %v1229_v38, %v1228_v5, %v3373_v8  ;;  %v581_v57 = vshrl.u32 %v4572_v13, %v3093_v54  ;;  %v3380_v35 = vsub.s32 %v1137_v53, %v1140_v31 }
 0x168   : > { %v1220_v37 = vsel %vm1214_vm11, %v1217_v16, %v1219_v1  ;;  %v576_v10 = vor.u32 %v575_v17, %v574_v59  ;;  %v579_v49 = vor.u32 %v578_v11, %v577_v3  ;;  %v531_v7 = vshll.u32 %v3337_v42, 23 }
 0x169   : > { %v733_v20 = vsub.s32 32, %v3311_v39  ;;  %v3384_v55 = vadd.s32 127, %v737_v58  ;;  %v582_v52 = vor.u32 %v581_v57, %v580_v43  ;;  %v942_v5 = vshll.u32 %v3207_v32, %v3313_v21 }
 0x16a   : > { %v943_v46 = vshrl.u32 %v3342_v63, %v941_v30  ;;  %v947_v8 = vshll.u32 %v946_v25, 23  ;;  %v1239_v54 = vadd.s32 1, %v3370_v61  ;;  %vm2464_vm13 = vcmp.lt.s32.totalorder %v2463_v44, 0 }
 0x16b   : > { %v1236_v53 = vmul.u32 %v1229_v38, %v1220_v37  ;;  %vm1238_vm14 = vc.u32 %v3374_v2, %v3369_v36  ;;  %vm589_vm15 = vcmp.lt.s32.totalorder %v3167_v40, 1  ;;  %v1143_v59 = vsub.s32 0, %v3380_v35 }
 0x16c   : > { %v1240_v42 = vsel %vm1238_vm14, %v1239_v54, %v3370_v61  ;;  %vm591_vm0 = vcmp.lt.s32.totalorder %v3167_v40, 3  ;;  %v597_v32 = vsel %vm589_vm15, %v576_v10, %v579_v49  ;;  %v594_v25 = vsel %vm592_vm12, %v582_v52, 2102212464 }
 0x16d   : > { %v1241_v43 = vadd.s32 %v1240_v42, %v1236_v53  ;;  %v599_v30 = vsel %vm591_vm0, %v582_v52, %v3226_v51  ;;  %v601_v21 = vsel %vm589_vm15, %v579_v49, %v582_v52  ;;  %v3405_v58 = vor.u32 %v943_v46, %v942_v5 }
 0x16e   : > { %v3407_v63 = vor.u32 4788187, %v947_v8  ;;  %v3409_v61 = vsel %vm2464_vm13, 0, %v2463_v44  ;;  %vm590_vm1 = vcmp.lt.s32.totalorder %v3167_v40, 2  ;;  %v603_v51 = vsel %vm591_vm0, %v3177_v6, %v3230_v0 }
 0x16f   : > { %v1242_v17 = vadd.s32 536870912, %v1241_v43  ;;  %v600_v38 = vsel %vm590_vm1, %v597_v32, %v599_v30  ;;  %v4579_v22 = vor.u32 8388608, %v3172_v62  ;;  %v2466_v3 = vmin.u32 %v1143_v59, %v3380_v35 }
 0x170   : > { %v593_v44 = vsel %vm589_vm15, %v3335_v45, %v576_v10  ;;  %v595_v11 = vsel %vm591_vm0, %v579_v49, %v594_v25  ;;  %v604_v34 = vsel %vm590_vm1, %v601_v21, %v603_v51  ;;  %v765_v62 = vand.u32 2147483647, %v3013_v23 }
 0x171   : > { %v605_v47 = vshll.u32 %v4579_v22, 8  ;;  %v3428_v9 = vshrl.u32 %v1242_v17, 30  ;;  %v3434_v6 = vor.u32 4788187, %v531_v7  ;;  %v3437_v0 = vshrl.u32 %v3305_v24, %v733_v20 }
 0x172   : > { %v739_v12 = vshll.u32 %v3384_v55, 23  ;;  %v951_v16 = vcvt.s32.f32 %v3405_v58  ;;  %v1029_v1 = vadd.s32 %v3211_v50, %v3217_v4  ;;  %v949_v37 = vand.u32 2147483647, %v3407_v63 }
 0x173   : > { %v3430_v33 = vmul.u32.u64.low %v605_v47, %v604_v34  ;;  %v3431_v31 = vmul.u32.u64.high %v605_v47, %v604_v34, %v3430_v33  ;;  %v3439_v19 = vmul.u32.u64.low %v605_v47, %v600_v38  ;;  %v3440_v45 = vmul.u32.u64.high %v605_v47, %v600_v38, %v3439_v19 }
 0x174   : > { %v1244_v57 = vshll.u32 %v3428_v9, 30  ;;  %v1049_v10 = vsub.s32 4294967266, %v3409_v61  ;;  %v596_v24 = vsel %vm590_vm1, %v593_v44, %v595_v11  ;;  %v783_v49 = vshrl.u32 %v4577_v14, %v3239_v26 }
 0x175   : > { %v1145_v7 = vclz %v2466_v3  ;;  %vm614_vm12 = vc.u32 %v3431_v31, %v3439_v19  ;;  %v772_v50 = vand.u32 8388607, %v765_v62  ;;  %v615_v4 = vadd.s32 1, %v3440_v45 }
 0x176   : > { %v3454_v20 = vsub.s32 %v1241_v43, %v1244_v57  ;;  %v4580_v52 = vmov 683565275   ;;  %v785_v40 = vshll.u32 %v4577_v14, %v3182_v29  ;;  %v786_v46 = vshrl.u32 %v4578_v41, %v3239_v26 }
 0x177   : > { %v782_v5 = vshll.u32 %v4580_v52, %v3182_v29  ;;  %v612_v54 = vmul.u32 %v605_v47, %v596_v24  ;;  %v788_v53 = vshll.u32 %v4578_v41, %v3182_v29  ;;  %v789_v59 = vshrl.u32 %v4572_v13, %v3239_v26 }
 0x178   : > { %v1247_v8 = vsub.s32 0, %v3454_v20  ;;  %v1050_v42 = vadd.s32 127, %v1049_v10  ;;  %v616_v32 = vsel %vm614_vm12, %v615_v4, %v3440_v45  ;;  %v787_v25 = vor.u32 %v786_v46, %v785_v40 }
 0x179   : > { %v784_v43 = vor.u32 %v783_v49, %v782_v5  ;;  %v1045_v30 = vsub.s32 32, %v3409_v61  ;;  %v617_v63 = vadd.s32 %v616_v32, %v612_v54  ;;  %v790_v17 = vor.u32 %v789_v59, %v788_v53  ;;  %v4581_v59 = vld [vmem:[#allocation18_spill] sm:$0xff]  ;;  %v4583_v32 = vld [vmem:[#allocation20_spill] sm:$0xff] }
 0x17a   : > { %v2470_v21 = vmin.u32 %v1247_v8, %v3454_v20  ;;  %v1046_v38 = vshll.u32 %v3298_v18, %v3409_v61  ;;  %v2467_v51 = vadd.s32 4294967294, %v1145_v7  ;;  %v773_v22 = vor.u32 8388608, %v772_v50 }
 0x17b   : > { %vm799_vm2 = vcmp.lt.s32.totalorder %v3265_v48, 3  ;;  %v618_v47 = vadd.s32 536870912, %v617_v63  ;;  %vm797_vm4 = vcmp.lt.s32.totalorder %v3265_v48, 1  ;;  %v1051_v44 = vshll.u32 %v1050_v42, 23 }
 0x17c   : > { %v1249_v29 = vclz %v2470_v21  ;;  %v811_v3 = vsel %vm799_vm2, %v3296_v28, %v3324_v27  ;;  %v805_v11 = vsel %vm797_vm4, %v784_v43, %v787_v25  ;;  %v807_v18 = vsel %vm799_vm2, %v790_v17, %v3320_v15  ;;  %v4584_v21 = vld [vmem:[#allocation13_spill] sm:$0xff] }
 0x17d   : > { %v809_v61 = vsel %vm797_vm4, %v787_v25, %v790_v17  ;;  %v1047_v34 = vshrl.u32 %v1029_v1, %v1045_v30  ;;  %v3490_v45 = vshrl.u32 %v618_v47, 30  ;;  %vm798_vm5 = vcmp.lt.s32.totalorder %v3265_v48, 2 }
 0x17e   : > { %v2471_v33 = vadd.s32 4294967294, %v1249_v29  ;;  %vm2468_vm6 = vcmp.lt.s32.totalorder %v2467_v51, 0  ;;  %v802_v28 = vsel %vm800_vm3, %v790_v17, 2102212464  ;;  %v812_v27 = vsel %vm798_vm5, %v809_v61, %v811_v3  ;;  %v4585_v17 = vld [vmem:[#allocation8_spill] sm:$0xff] }
 0x17f   : > { %v813_v57 = vshll.u32 %v773_v22, 8  ;;  %v620_v15 = vshll.u32 %v3490_v45, 30  ;;  %v781_v10 = vshrl.u32 %v4580_v52, %v3239_v26  ;;  %v808_v1 = vsel %vm798_vm5, %v805_v11, %v807_v18  ;;  %v4589_v18 = vld [vmem:[#allocation10_spill] sm:$0xff] }
 0x180   : > { %vm2472_vm7 = vcmp.lt.s32.totalorder %v2471_v33, 0  ;;  %v1052_v24 = vor.u32 4788187, %v1051_v44  ;;  %v3507_v4 = vsel %vm2468_vm6, 0, %v2467_v51  ;;  %v803_v46 = vsel %vm799_vm2, %v787_v25, %v802_v28 }
 0x181   : > { %v3502_v49 = vsel %vm2472_vm7, 0, %v2471_v33  ;;  %v3504_v7 = vmul.u32.u64.low %v813_v57, %v812_v27  ;;  %v3505_v50 = vmul.u32.u64.high %v813_v57, %v812_v27, %v3504_v7  ;;  %v3509_v5 = vsub.s32 %v617_v63, %v620_v15 }
 0x182   : > { %v801_v40 = vsel %vm797_vm4, %v781_v10, %v784_v43  ;;  %v1048_v26 = vor.u32 %v1047_v34, %v1046_v38  ;;  %v1257_v8 = vsub.s32 4294967266, %v3502_v49  ;;  %v4582_v42 = vshll.u32 %v3095_v56, %v4581_v59 }
 0x183   : > { %v3516_v54 = vmul.u32.u64.low %v813_v57, %v808_v1  ;;  %v3517_v53 = vmul.u32.u64.high %v813_v57, %v808_v1, %v3516_v54  ;;  %v734_v63 = vshll.u32 %v4584_v21, %v3311_v39  ;;  %v952_v43 = vmul.f32 %v951_v16, %v949_v37 }
 0x184   : > { %v528_v30 = vor.u32 %v4583_v32, %v4582_v42  ;;  %v623_v25 = vsub.s32 0, %v3509_v5  ;;  %vm871_vm3 = vcmp.lt.s32.totalorder %v4585_v17, 0  ;;  %v1053_v38 = vand.u32 2147483647, %v1052_v24 }
 0x185   : > { %v1153_v51 = vsub.s32 4294967266, %v3507_v4  ;;  %v804_v22 = vsel %vm798_vm5, %v801_v40, %v803_v46  ;;  %v533_v56 = vand.u32 2147483647, %v3434_v6  ;;  %v736_v29 = vor.u32 %v3437_v0, %v734_v63  ;;  %v4590_v40 = vld [vmem:[#allocation19_spill] sm:$0xff]  ;;  %v4591_v46 = vld [vmem:[#allocation17_spill] sm:$0xff] }
 0x186   : > { %v2446_v47 = vmin.u32 %v623_v25, %v3509_v5  ;;  %vm822_vm8 = vc.u32 %v3505_v50, %v3516_v54  ;;  %v740_v39 = vor.u32 4788187, %v739_v12  ;;  %v4586_v58 = vand.u32 2147483647, %v4585_v17 }
 0x187   : > { %v1055_v48 = vcvt.s32.f32 %v1048_v26  ;;  %v1258_v37 = vadd.s32 127, %v1257_v8  ;;  %v823_v6 = vadd.s32 1, %v3517_v53  ;;  %v535_v3 = vcvt.s32.f32 %v528_v30 }
 0x188   : > { %vm3542_vm9 = vcmp.le.f32.partialorder %v4586_v58, 0.7853982  ;;  %v953_v0 = vxor.u32 2147483648, %v952_v43  ;;  %v625_v44 = vclz %v2446_v47  ;;  %v820_v11 = vmul.u32 %v813_v57, %v804_v22 }
 0x189   : > { %vm975_vm10 = vcmp.lt.s32.totalorder %v4589_v18, 0  ;;  %v1056_v61 = vmul.f32 %v1055_v48, %v1053_v38  ;;  %v1154_v34 = vadd.s32 127, %v1153_v51  ;;  %v1253_v55 = vsub.s32 32, %v3502_v49 }
 0x18a   : > { %v824_v12 = vsel %vm822_vm8, %v823_v6, %v3517_v53  ;;  %v536_v33 = vmul.f32 %v535_v3, %v533_v56  ;;  %v1149_v28 = vsub.s32 32, %v3507_v4  ;;  %v2447_v27 = vadd.s32 4294967294, %v625_v44  ;;  %v4592_v53 = vld [vmem:[#allocation5_spill] sm:$0xff]  ;;  %v4593_v6 = vld [vmem:[#allocation6_spill] sm:$0xff] }
 0x18b   : > { %v825_v15 = vadd.s32 %v824_v12, %v820_v11  ;;  %v741_v10 = vand.u32 2147483647, %v740_v39  ;;  %v743_v1 = vcvt.s32.f32 %v736_v29  ;;  %v1237_v24 = vadd.s32 %v3369_v36, %v3374_v2 }
 0x18c   : > { %v1259_v7 = vshll.u32 %v1258_v37, 23  ;;  %v954_v57 = vsel %vm871_vm3, %v953_v0, %v952_v43  ;;  %v1133_v26 = vadd.s32 %v4591_v46, %v4590_v40  ;;  %vm2448_vm11 = vcmp.lt.s32.totalorder %v2447_v27, 0 }
 0x18d   : > { %v826_v8 = vadd.s32 536870912, %v825_v15  ;;  %vm455_vm13 = vcmp.lt.s32.totalorder %v4592_v53, 0  ;;  %v1057_v59 = vxor.u32 2147483648, %v1056_v61  ;;  %v1155_v42 = vshll.u32 %v1154_v34, 23 }
 0x18e   : > { %v1255_v32 = vshrl.u32 %v1237_v24, %v1253_v55  ;;  %v628_v30 = vsel %vm2448_vm11, 0, %v2447_v27  ;;  %v1151_v21 = vshrl.u32 %v1133_v26, %v1149_v28  ;;  %v613_v63 = vadd.s32 %v3439_v19, %v3431_v31 }
 0x18f   : > { %v629_v36 = vsub.s32 32, %v628_v30  ;;  %v633_v2 = vsub.s32 4294967266, %v628_v30  ;;  %v744_v25 = vmul.f32 %v743_v1, %v741_v10  ;;  %v1254_v43 = vshll.u32 %v3454_v20, %v3502_v49 }
 0x190   : > { %v1260_v38 = vor.u32 4788187, %v1259_v7  ;;  %v3562_v51 = vshrl.u32 %v826_v8, 30  ;;  %v957_v22 = vsel %vm3542_vm9, %v4585_v17, %v954_v57  ;;  %v1150_v56 = vshll.u32 %v3380_v35, %v3507_v4  ;;  %v4597_v7 = vld [vmem:[#allocation9_spill] sm:$0xff] }
 0x191   : > { %v631_v29 = vshrl.u32 %v613_v63, %v629_v36  ;;  %v634_v47 = vadd.s32 127, %v633_v2  ;;  %v1156_v39 = vor.u32 4788187, %v1155_v42  ;;  %v1256_v31 = vor.u32 %v1255_v32, %v1254_v43  ;;  %v4601_v32 = vld [vmem:[#allocation11_spill] sm:$0xff] }
 0x192   : > { %v630_v19 = vshll.u32 %v3509_v5, %v628_v30  ;;  %v828_v58 = vshll.u32 %v3562_v51, 30  ;;  %v537_v48 = vxor.u32 2147483648, %v536_v33  ;;  %v1058_v20 = vsel %vm975_vm10, %v1057_v59, %v1056_v61  ;;  %v4602_v30 = vld [vmem:[#allocation7_spill] sm:$0xff] }
 0x193   : > { %v1152_v49 = vor.u32 %v1151_v21, %v1150_v56  ;;  %v635_v37 = vshll.u32 %v634_v47, 23  ;;  %vm663_vm14 = vcmp.lt.s32.totalorder %v4593_v6, 0  ;;  %v1261_v3 = vand.u32 2147483647, %v1260_v38 }
 0x194   : > { %v632_v0 = vor.u32 %v631_v29, %v630_v19  ;;  %v3574_v44 = vsub.s32 %v825_v15, %v828_v58  ;;  %v745_v35 = vxor.u32 2147483648, %v744_v25  ;;  %2662 = vcosq.f32 %v957_v22 }
 0x195   : > { %v4594_v4 = vand.u32 2147483647, %v4589_v18  ;;  %v636_v11 = vor.u32 4788187, %v635_v37  ;;  %v1157_v34 = vand.u32 2147483647, %v1156_v39  ;;  %v1263_v55 = vcvt.s32.f32 %v1256_v31 }
 0x196   : > { %v831_v12 = vsub.s32 0, %v3574_v44  ;;  %v538_v28 = vsel %vm455_vm13, %v537_v48, %v536_v33  ;;  %2664 = vsinq.f32 %v957_v22  ;;  %v1159_v27 = vcvt.s32.f32 %v1152_v49  ;;  %v4609_v22 = vld [vmem:[#allocation15_spill] sm:$0xff]  ;;  %v4613_v37 = vld [vmem:[#allocation12_spill] sm:$0xff] }
 0x197   : > { %vm3578_vm15 = vcmp.le.f32.partialorder %v4594_v4, 0.7853982  ;;  %v637_v15 = vand.u32 2147483647, %v636_v11  ;;  %v1264_v10 = vmul.f32 %v1263_v55, %v1261_v3  ;;  %v639_v1 = vcvt.s32.f32 %v632_v0 }
 0x198   : > { %v1061_v61 = vsel %vm3578_vm15, %v4589_v18, %v1058_v20  ;;  %v2454_v24 = vmin.u32 %v831_v12, %v3574_v44  ;;  %v539_v57 = vsub.s32 4, %v4597_v7  ;;  %v746_v40 = vsel %vm663_vm14, %v745_v35, %v744_v25 }
 0x199   : > { %2666 = vcosq.f32 %v1061_v61  ;;  %v4598_v46 = vand.u32 2147483647, %v4592_v53  ;;  %v1160_v33 = vmul.f32 %v1159_v27, %v1157_v34  ;;  %v640_v8 = vmul.f32 %v639_v1, %v637_v15 }
 0x19a   : > { %v833_v59 = vclz %v2454_v24  ;;  %2668 = vsinq.f32 %v1061_v61  ;;  %vm1079_vm1 = vcmp.lt.s32.totalorder %v4601_v32, 0  ;;  %v4603_v21 = vand.u32 2147483647, %v4602_v30 }
 0x19b   : > { %vm3594_vm0 = vcmp.le.f32.partialorder %v4598_v46, 0.7853982  ;;  %vm559_vm2 = vcmp.lt.s32.totalorder %v4602_v30, 0  ;;  %v1265_v36 = vxor.u32 2147483648, %v1264_v10  ;;  %v540_v25 = vsel %vm455_vm13, %v539_v57, %v4597_v7 }
 0x19c   : > { %v541_v42 = vsel %vm3594_vm0, %v4592_v53, %v538_v28  ;;  %vm3604_vm12 = vcmp.le.f32.partialorder %v4603_v21, 0.7853982  ;;  %v2455_v2 = vadd.s32 4294967294, %v833_v59  ;;  %v4606_v43 = vand.u32 2147483647, %v4593_v6 }
 0x19d   : > { %vm1183_vm5 = vcmp.lt.s32.totalorder %v4609_v22, 0  ;;  %v643_v56 = vsub.s32 4, %v3490_v45  ;;  %2670 = vcosq.f32 %v541_v42  ;;  %v4610_v47 = vand.u32 2147483647, %v4601_v32 }
 0x19e   : > { %vm3614_vm4 = vcmp.le.f32.partialorder %v4606_v43, 0.7853982  ;;  %v1161_v31 = vxor.u32 2147483648, %v1160_v33  ;;  %v641_v19 = vxor.u32 2147483648, %v640_v8  ;;  %vm2456_vm7 = vcmp.lt.s32.totalorder %v2455_v2, 0  ;;  %v3629_v58 = vpop.eup %2662 }
 0x19f   : > { %v749_v29 = vsel %vm3614_vm4, %v4593_v6, %v746_v40  ;;  %vm3625_vm6 = vcmp.le.f32.partialorder %v4610_v47, 0.7853982  ;;  %2672 = vsinq.f32 %v541_v42  ;;  %v821_v48 = vadd.s32 %v3516_v54, %v3505_v50  ;;  %v4617_v40 = vld [vmem:[#allocation16_spill] sm:$0xff] }
 0x1a0   : > { %v836_v20 = vsel %vm2456_vm7, 0, %v2455_v2  ;;  %v542_v49 = vsel %vm3594_vm0, 0, %v540_v25  ;;  %v747_v3 = vsub.s32 4, %v4613_v37  ;;  %v1266_v0 = vsel %vm1183_vm5, %v1265_v36, %v1264_v10  ;;  %v3638_v11 = vpop.eup %2664 }
 0x1a1   : > { %v837_v35 = vsub.s32 32, %v836_v20  ;;  %v841_v4 = vsub.s32 4294967266, %v836_v20  ;;  %2674 = vcosq.f32 %v749_v29  ;;  %v4614_v61 = vand.u32 2147483647, %v4609_v22 }
 0x1a2   : > { %v644_v50 = vsel %vm559_vm2, %v643_v56, %v3490_v45  ;;  %v851_v54 = vsub.s32 4, %v3562_v51  ;;  %2676 = vsinq.f32 %v749_v29  ;;  %v642_v55 = vsel %vm559_vm2, %v641_v19, %v640_v8 }
 0x1a3   : > { %vm3642_vm8 = vcmp.le.f32.partialorder %v4614_v61, 0.7853982  ;;  %v838_v12 = vshll.u32 %v3574_v44, %v836_v20  ;;  %v839_v28 = vshrl.u32 %v821_v48, %v837_v35  ;;  %v842_v27 = vadd.s32 127, %v841_v4  ;;  %v3653_v15 = vpop.eup %2666 }
 0x1a4   : > { %v1162_v10 = vsel %vm1079_vm1, %v1161_v31, %v1160_v33  ;;  %v1269_v1 = vsel %vm3642_vm8, %v4609_v22, %v1266_v0  ;;  %v546_v45 = vadd.s32 3, %v542_v49  ;;  %v748_v24 = vsel %vm663_vm14, %v747_v3, %v4613_v37  ;;  %v3666_v26 = vpop.eup %2668 }
 0x1a5   : > { %v646_v7 = vsel %vm3604_vm12, 0, %v644_v50  ;;  %v840_v44 = vor.u32 %v839_v28, %v838_v12  ;;  %v843_v57 = vshll.u32 %v842_v27, 23  ;;  %v1059_v46 = vsub.s32 4, %v4617_v40  ;;  %v4620_v50 = vld [vmem:[#allocation14_spill] sm:$0xff] }
 0x1a6   : > { %v645_v33 = vsel %vm3604_vm12, %v4602_v30, %v642_v55  ;;  %vm3673_vm11 = vcmp.le.f32.partialorder %v765_v62, 0.7853982  ;;  %vm767_vm13 = vcmp.lt.s32.totalorder %v3013_v23, 0  ;;  %v1267_v59 = vsub.s32 4, %v3428_v9 }
 0x1a7   : > { %2678 = vcosq.f32 %v1269_v1  ;;  %v844_v42 = vor.u32 4788187, %v843_v57  ;;  %v852_v21 = vsel %vm767_vm13, %v851_v54, %v3562_v51  ;;  %v750_v63 = vsel %vm3614_vm4, 0, %v748_v24  ;;  %v2671_v36 = vpop.eup %2670 }
 0x1a8   : > { %v1165_v62 = vsel %vm3625_vm6, %v4601_v32, %v1162_v10  ;;  %2680 = vsinq.f32 %v1269_v1  ;;  %v650_v2 = vadd.s32 3, %v646_v7  ;;  %v547_v25 = vand.u32 3, %v546_v45 }
 0x1a9   : > { %v2673_v43 = vpop.eup %2672  ;;  %2682 = vcosq.f32 %v645_v33  ;;  %v845_v56 = vand.u32 2147483647, %v844_v42  ;;  %v847_v29 = vcvt.s32.f32 %v840_v44  ;;  %v1060_v47 = vsel %vm975_vm10, %v1059_v46, %v4617_v40 }
 0x1aa   : > { %2684 = vsinq.f32 %v645_v33  ;;  %v854_v51 = vsel %vm3673_vm11, 0, %v852_v21  ;;  %v754_v38 = vadd.s32 3, %v750_v63  ;;  %v1268_v31 = vsel %vm1183_vm5, %v1267_v59, %v3428_v9 }
 0x1ab   : > { %v2675_v19 = vpop.eup %2674  ;;  %2686 = vcosq.f32 %v1165_v62  ;;  %v848_v48 = vmul.f32 %v847_v29, %v845_v56  ;;  %v1163_v20 = vsub.s32 4, %v3359_v60  ;;  %v550_v37 = vxor.u32 2147483648, %v2673_v43 }
 0x1ac   : > { %v2677_v49 = vpop.eup %2676  ;;  %2688 = vsinq.f32 %v1165_v62  ;;  %v553_v3 = vxor.u32 2147483648, %v2671_v36  ;;  %v1062_v0 = vsel %vm3578_vm15, 0, %v1060_v47  ;;  %v858_v4 = vadd.s32 3, %v854_v51 }
 0x1ad   : > { %v849_v35 = vxor.u32 2147483648, %v848_v48  ;;  %v1270_v61 = vsel %vm3642_vm8, 0, %v1268_v31  ;;  %v955_v54 = vsub.s32 4, %v4620_v50  ;;  %v3701_v9 = vand.u32 3, %v650_v2 }
 0x1ae   : > { %vm552_vm10 = vcmp.eq.s32.totalorder %v547_v25, 2  ;;  %v755_v55 = vand.u32 3, %v754_v38  ;;  %v761_v12 = vxor.u32 2147483648, %v2675_v19  ;;  %v758_v27 = vxor.u32 2147483648, %v2677_v49 }
 0x1af   : > { %v850_v28 = vsel %vm767_vm13, %v849_v35, %v848_v48  ;;  %v1066_v10 = vadd.s32 3, %v1062_v0  ;;  %v1164_v5 = vsel %vm1079_vm1, %v1163_v20, %v3359_v60  ;;  %vm549_vm14 = vcmp.eq.s32.totalorder %v547_v25, 0 }
 0x1b0   : > { %v853_v34 = vsel %vm3673_vm11, %v3013_v23, %v850_v28  ;;  %v554_v1 = vsel %vm552_vm10, %v553_v3, %v2673_v43  ;;  %vm753_vm15 = vweird.f32 %v4593_v6  ;;  %v1274_v45 = vadd.s32 3, %v1270_v61 }
 0x1b1   : > { %v2679_v24 = vpop.eup %2678  ;;  %2690 = vcosq.f32 %v853_v34  ;;  %v3712_v7 = vand.u32 3, %v858_v4  ;;  %v551_v44 = vsel %vm549_vm14, %v2671_v36, %v550_v37  ;;  %v956_v57 = vsel %vm871_vm3, %v955_v54, %v4620_v50 }
 0x1b2   : > { %v2681_v40 = vpop.eup %2680  ;;  %vm653_vm0 = vcmp.eq.s32.totalorder %v3701_v9, 0  ;;  %vm656_vm1 = vcmp.eq.s32.totalorder %v3701_v9, 2  ;;  %2692 = vsinq.f32 %v853_v34  ;;  %vm757_vm12 = vcmp.eq.s32.totalorder %v755_v55, 0 }
 0x1b3   : > { %vm760_vm2 = vcmp.eq.s32.totalorder %v755_v55, 2  ;;  %v1166_v60 = vsel %vm3625_vm6, 0, %v1164_v5  ;;  %v2683_v46 = vpop.eup %2682  ;;  %vm548_vm4 = vcmp.lt.s32.totalorder %v547_v25, 2  ;;  %v759_v33 = vsel %vm757_vm12, %v2675_v19, %v758_v27 }
 0x1b4   : > { %v762_v8 = vsel %vm760_vm2, %v761_v12, %v2677_v49  ;;  %v1067_v59 = vand.u32 3, %v1066_v10  ;;  %v2685_v42 = vpop.eup %2684  ;;  %v3721_v21 = vsel %vm548_vm4, %v551_v44, %v554_v1  ;;  %v1070_v63 = vxor.u32 2147483648, %v3666_v26 }
 0x1b5   : > { %v1275_v36 = vand.u32 3, %v1274_v45  ;;  %v958_v62 = vsel %vm3542_vm9, 0, %v956_v57  ;;  %v2687_v2 = vpop.eup %2686  ;;  %vm652_vm3 = vcmp.lt.s32.totalorder %v3701_v9, 2  ;;  %vm756_vm5 = vcmp.lt.s32.totalorder %v755_v55, 2 }
 0x1b6   : > { %v1278_v39 = vxor.u32 2147483648, %v2681_v40  ;;  %v1281_v43 = vxor.u32 2147483648, %v2679_v24  ;;  %v1170_v56 = vadd.s32 3, %v1166_v60  ;;  %v2689_v25 = vpop.eup %2688  ;;  %vm864_vm7 = vcmp.eq.s32.totalorder %v3712_v7, 2 }
 0x1b7   : > { %v763_v29 = vsel %vm756_vm5, %v759_v33, %v762_v8  ;;  %v1073_v47 = vxor.u32 2147483648, %v3653_v15  ;;  %vm1273_vm8 = vweird.f32 %v4609_v22  ;;  %v654_v51 = vxor.u32 2147483648, %v2685_v42 }
 0x1b8   : > { %v657_v16 = vxor.u32 2147483648, %v2683_v46  ;;  %vm860_vm9 = vcmp.lt.s32.totalorder %v3712_v7, 2  ;;  %vm1068_vm11 = vcmp.lt.s32.totalorder %v1067_v59, 2  ;;  %v962_v38 = vadd.s32 3, %v958_v62 }
 0x1b9   : > { %vm649_vm13 = vweird.f32 %v4602_v30  ;;  %vm857_vm10 = vweird.f32 %v3013_v23  ;;  %vm1065_vm14 = vweird.f32 %v4589_v18  ;;  %vm1069_vm12 = vcmp.eq.s32.totalorder %v1067_v59, 0 }
 0x1ba   : > { %vm1072_vm2 = vcmp.eq.s32.totalorder %v1067_v59, 2  ;;  %vm1277_vm4 = vcmp.eq.s32.totalorder %v1275_v36, 0  ;;  %vm1280_vm5 = vcmp.eq.s32.totalorder %v1275_v36, 2  ;;  %v764_v31 = vsel %vm753_vm15, nan, %v763_v29  ;;  %v1288_v59 = vld [vmem:[%s4498_s3 + $0x18] sm:$0xff] }
 0x1bb   : > { %v1279_v19 = vsel %vm1277_vm4, %v2679_v24, %v1278_v39  ;;  %v1282_v48 = vsel %vm1280_vm5, %v1281_v43, %v2681_v40  ;;  %v1171_v20 = vand.u32 3, %v1170_v56  ;;  %v1071_v49 = vsel %vm1069_vm12, %v3653_v15, %v1070_v63  ;;  %v2691_v35 = vpop.eup %2690  ;;  %v1301_v43 = vpop.permute.xlu1 %1300 }
 0x1bc   : > { %v1074_v37 = vsel %vm1072_vm2, %v1073_v47, %v3666_v26  ;;  %v1174_v3 = vxor.u32 2147483648, %v2689_v25  ;;  %v1177_v0 = vxor.u32 2147483648, %v2687_v2  ;;  %v655_v4 = vsel %vm653_vm0, %v2683_v46, %v654_v51  ;;  %v2693_v6 = vpop.eup %2692 }
 0x1bd   : > { %v658_v61 = vsel %vm656_vm1, %v657_v16, %v2685_v42  ;;  %vm1276_vm6 = vcmp.lt.s32.totalorder %v1275_v36, 2  ;;  %v963_v50 = vand.u32 3, %v962_v38  ;;  %v865_v54 = vxor.u32 2147483648, %v2691_v35  ;;  %v1296_v42 = vpop.permute.xlu0 %1295 }
 0x1be   : > { %v1283_v55 = vsel %vm1276_vm6, %v1279_v19, %v1282_v48  ;;  %v966_v12 = vxor.u32 2147483648, %v3638_v11  ;;  %v969_v15 = vxor.u32 2147483648, %v3629_v58  ;;  %v862_v28 = vxor.u32 2147483648, %v2693_v6 }
 0x1bf   : > { %v1075_v26 = vsel %vm1068_vm11, %v1071_v49, %v1074_v37  ;;  %vm1173_vm15 = vcmp.eq.s32.totalorder %v1171_v20, 0  ;;  %vm1176_vm12 = vcmp.eq.s32.totalorder %v1171_v20, 2  ;;  %v659_v27 = vsel %vm652_vm3, %v655_v4, %v658_v61 }
 0x1c0   : > { %v866_v10 = vsel %vm864_vm7, %v865_v54, %v2693_v6  ;;  %v1175_v5 = vsel %vm1173_vm15, %v2687_v2, %v1174_v3  ;;  %v1178_v34 = vsel %vm1176_vm12, %v1177_v0, %v2689_v25  ;;  %vm4621_vm0 = vcmp.eq.s32.totalorder %v3712_v7, 0 }
 0x1c1   : > { %v863_v1 = vsel %vm4621_vm0, %v2691_v35, %v862_v28  ;;  %v1284_v45 = vsel %vm1273_vm8, nan, %v1283_v55  ;;  %vm965_vm1 = vcmp.eq.s32.totalorder %v963_v50, 0  ;;  %vm968_vm6 = vcmp.eq.s32.totalorder %v963_v50, 2 }
 0x1c2   : > { %v867_v24 = vsel %vm860_vm9, %v863_v1, %v866_v10  ;;  %v967_v44 = vsel %vm965_vm1, %v3629_v58, %v966_v12  ;;  %v970_v9 = vsel %vm968_vm6, %v969_v15, %v3638_v11  ;;  %vm1172_vm3 = vcmp.lt.s32.totalorder %v1171_v20, 2 }
 0x1c3   : > { %v660_v57 = vsel %vm649_vm13, nan, %v659_v27  ;;  %v868_v40 = vsel %vm857_vm10, nan, %v867_v24  ;;  %v1076_v22 = vsel %vm1065_vm14, nan, %v1075_v26  ;;  %v1179_v60 = vsel %vm1172_vm3, %v1175_v5, %v1178_v34 }
 0x1c4   : > { %v2517_v46 = vpack.c.bf16 %v868_v40, %v660_v57  ;;  %vm4622_vm7 = vweird.f32 %v4592_v53  ;;  %v2521_v33 = vpack.c.bf16 %v1284_v45, %v1076_v22  ;;  %vm964_vm8 = vcmp.lt.s32.totalorder %v963_v50, 2  ;;  %v1285_v53 = vld [vmem:[%s4498_s3] sm:$0xff] }
 0x1c5   : > { %v556_v7 = vsel %vm4622_vm7, nan, %v3721_v21  ;;  %v971_v11 = vsel %vm964_vm8, %v967_v44, %v970_v9  ;;  %vm1169_vm9 = vweird.f32 %v4601_v32  ;;  %vm961_vm11 = vweird.f32 %v4585_v17  ;;  %v1286_v32 = vld [vmem:[%s4498_s3 + $0x8] sm:$0xff]  ;;  %v1287_v17 = vld [vmem:[%s4498_s3 + $0x10] sm:$0xff] }
 0x1c6   : > { %v2519_v58 = vpack.c.bf16 %v764_v31, %v556_v7  ;;  %2518 = vmatprep.subr.bf16.mxu1 %v2517_v46  ;;  %v1180_v30 = vsel %vm1169_vm9, nan, %v1179_v60  ;;  %v972_v23 = vsel %vm961_vm11, nan, %v971_v11  ;;  %vm1313_vm13 = vcmask 261120  }
 0x1c7   : > { %v2523_v18 = vpack.c.bf16 %v1180_v30, %v972_v23  ;;  %v4623_v8 = vmov 0.0   ;;  %v4624_v60 = vmov 920167782   ;;  %v4625_v23 = vmov 1326507024  }
 0x1c8   : > { %2520 = vmatpush1.bf16.msra.mxu1 %v2519_v58 }
 0x1c9   : > { %2522 = vmatprep.subr.bf16.mxu1 %v2521_v33 }
 0x1cc   : > { %2524 = vmatpush1.bf16.msra.mxu1 %v2523_v18 }
 0x1cf   : > { %2473 = vmatmul.mubr.msk.f32.vlgmr.msra.gmra.mrb[0].mxu1 %vm1313_vm13, %v1285_v53 }
 0x1d0   : > { %1396 = vmatprep.mubr.f32.mxu1 %v4623_v8 }
 0x1d3   : > { %2474 = vmatmul.mubr.msk.f32.gmra.mrb[2].mxu1 %vm1313_vm13, %v1286_v32 }
 0x1d4   : > { %1402 = vmatprep.mubr.f32.mxu1 %v4623_v8 }
 0x1d7   : > { %2475 = vmatmul.mubr.msk.f32.gmra.mrb[4].mxu1 %vm1313_vm13, %v1287_v17 }
 0x1d8   : > { %1408 = vmatprep.mubr.f32.mxu1 %v4623_v8 }
 0x1db   : > { %2476 = vmatmul.mubr.msk.f32.gmra.mrb[6].mxu1 %vm1313_vm13, %v1288_v59 }
 0x2a2   : > { %v1392_v21 = vpop.f32.mrb[0].mxu1 }
 0x2a3   : > { %v3789_v63 = vadd.f32 %v1392_v21, %v1296_v42  ;;  %v1394_v36 = vpop.f32.mrb[1].mxu1 }
 0x2a4   : > { %v3791_v62 = vadd.f32 %v1394_v36, %v1296_v42 }
 0x2a5   : > { %v1415_v2 = vand.u32 2147483647, %v3789_v63  ;;  %v1418_v39 = vand.u32 2139095040, %v3789_v63 }
 0x2a6   : > { %v1519_v56 = vand.u32 2147483647, %v3791_v62  ;;  %v1522_v25 = vand.u32 2139095040, %v3791_v62  ;;  %v1398_v29 = vpop.f32.mrb[2].mxu1 }
 0x2a7   : > { %v1419_v47 = vshrl.u32 %v1418_v39, 23  ;;  %v3797_v51 = vadd.f32 %v1398_v29, %v1301_v43  ;;  %v1400_v16 = vpop.f32.mrb[3].mxu1  ;;  %v1422_v38 = vand.u32 8388607, %v1415_v2 }
 0x2a8   : > { %v1523_v31 = vshrl.u32 %v1522_v25, 23  ;;  %v1526_v19 = vand.u32 8388607, %v1519_v56  ;;  %v3810_v26 = vadd.f32 %v1400_v16, %v1301_v43 }
 0x2a9   : > { %v2477_v48 = vadd.s32 4294967169, %v1419_v47  ;;  %v1626_v49 = vand.u32 2139095040, %v3797_v51  ;;  %v1423_v0 = vor.u32 8388608, %v1422_v38  ;;  %v4555_v1 = vand.u32 2147483647, %v3797_v51 }
 0x2aa   : > { %v2481_v20 = vadd.s32 4294967169, %v1523_v31  ;;  %v3804_v37 = vpop.f32.mrb[4].mxu1  ;;  %v1527_v35 = vor.u32 8388608, %v1526_v19 }
 0x2ab   : > { %v1425_v3 = vadd.s32 1, %v2477_v48  ;;  %v1627_v61 = vshrl.u32 %v1626_v49, 23  ;;  %v3806_v50 = vpop.f32.mrb[5].mxu1  ;;  %v3814_v10 = vshll.u32 %v1423_v0, 8 }
 0x2ac   : > { %v1529_v4 = vadd.s32 1, %v2481_v20  ;;  %v3818_v34 = vshll.u32 %v1527_v35, 8 }
 0x2ad   : > { %vm1426_vm10 = vcmp.gt.s32.totalorder %v1425_v3, 0  ;;  %v2485_v54 = vadd.s32 4294967169, %v1627_v61 }
 0x2ae   : > { %v1427_v6 = vsel %vm1426_vm10, %v1425_v3, 0  ;;  %vm1530_vm14 = vcmp.gt.s32.totalorder %v1529_v4, 0  ;;  %v3808_v55 = vpop.f32.mrb[6].mxu1 }
 0x2af   : > { %v1428_v12 = vshrl.u32 %v1427_v6, 5  ;;  %v1429_v15 = vand.u32 31, %v1427_v6  ;;  %v1531_v28 = vsel %vm1530_vm14, %v1529_v4, 0  ;;  %v3812_v27 = vpop.f32.mrb[7].mxu1  ;;  %v3822_v9 = vadd.s32 1, %v2485_v54 }
 0x2b0   : > { %v3816_v5 = vshrl.u32 %v1531_v28, 5  ;;  %v1533_v44 = vand.u32 31, %v1531_v28 }
 0x2b1   : > { %v1430_v45 = vsub.s32 32, %v1429_v15  ;;  %v1432_v24 = vshll.u32 %v4580_v52, %v1429_v15  ;;  %v1435_v57 = vshll.u32 %v4577_v14, %v1429_v15  ;;  %v1438_v40 = vshll.u32 %v4578_v41, %v1429_v15 }
 0x2b2   : > { %v1441_v22 = vshll.u32 %v4572_v13, %v1429_v15  ;;  %v1444_v46 = vshll.u32 %v4624_v60, %v1429_v15  ;;  %vm1447_vm2 = vcmp.lt.s32.totalorder %v1428_v12, 1  ;;  %vm1448_vm4 = vcmp.lt.s32.totalorder %v1428_v12, 2 }
 0x2b3   : > { %v1433_v7 = vshrl.u32 %v4577_v14, %v1430_v45  ;;  %v1436_v33 = vshrl.u32 %v4578_v41, %v1430_v45  ;;  %v1439_v58 = vshrl.u32 %v4572_v13, %v1430_v45  ;;  %v1431_v11 = vshrl.u32 %v4580_v52, %v1430_v45 }
 0x2b4   : > { %v1442_v30 = vshrl.u32 %v4624_v60, %v1430_v45  ;;  %v1445_v18 = vshrl.u32 %v4625_v23, %v1430_v45  ;;  %v1534_v17 = vsub.s32 32, %v1533_v44  ;;  %vm1449_vm5 = vcmp.lt.s32.totalorder %v1428_v12, 3 }
 0x2b5   : > { %v1434_v53 = vor.u32 %v1433_v7, %v1432_v24  ;;  %v1437_v8 = vor.u32 %v1436_v33, %v1435_v57  ;;  %v1440_v32 = vor.u32 %v1439_v58, %v1438_v40  ;;  %vm1450_vm15 = vcmp.lt.s32.totalorder %v1428_v12, 4 }
 0x2b6   : > { %v1443_v59 = vor.u32 %v1442_v30, %v1441_v22  ;;  %v1446_v42 = vor.u32 %v1445_v18, %v1444_v46  ;;  %v1536_v16 = vshll.u32 %v4580_v52, %v1533_v44  ;;  %v1537_v19 = vshrl.u32 %v4577_v14, %v1534_v17 }
 0x2b7   : > { %v1451_v21 = vsel %vm1447_vm2, %v1431_v11, %v1434_v53  ;;  %v1452_v36 = vsel %vm1450_vm15, %v1440_v32, 2102212464  ;;  %v1455_v39 = vsel %vm1447_vm2, %v1434_v53, %v1437_v8  ;;  %v1459_v43 = vsel %vm1447_vm2, %v1437_v8, %v1440_v32 }
 0x2b8   : > { %v1453_v25 = vsel %vm1449_vm5, %v1437_v8, %v1452_v36  ;;  %v1456_v29 = vsel %vm1450_vm15, %v1443_v59, 920167782  ;;  %v1460_v47 = vsel %vm1450_vm15, %v1446_v42, 1326507024  ;;  %v1539_v48 = vshll.u32 %v4577_v14, %v1533_v44 }
 0x2b9   : > { %v1457_v38 = vsel %vm1449_vm5, %v1440_v32, %v1456_v29  ;;  %v1461_v31 = vsel %vm1449_vm5, %v1443_v59, %v1460_v47  ;;  %v1454_v20 = vsel %vm1448_vm4, %v1451_v21, %v1453_v25  ;;  %v1540_v0 = vshrl.u32 %v4578_v41, %v1534_v17 }
 0x2ba   : > { %v1458_v49 = vsel %vm1448_vm4, %v1455_v39, %v1457_v38  ;;  %v1462_v3 = vsel %vm1448_vm4, %v1459_v43, %v1461_v31  ;;  %v1538_v54 = vor.u32 %v1537_v19, %v1536_v16  ;;  %v1542_v28 = vshll.u32 %v4578_v41, %v1533_v44 }
 0x2bb   : > { %v3845_v35 = vmul.u32.u64.low %v3814_v10, %v1462_v3  ;;  %v3846_v4 = vmul.u32.u64.high %v3814_v10, %v1462_v3, %v3845_v35  ;;  %v3849_v61 = vmul.u32.u64.low %v3814_v10, %v1458_v49  ;;  %v3850_v6 = vmul.u32.u64.high %v3814_v10, %v1458_v49, %v3849_v61 }
 0x2bc   : > { %v1541_v15 = vor.u32 %v1540_v0, %v1539_v48  ;;  %v1543_v45 = vshrl.u32 %v4572_v13, %v1534_v17  ;;  %v1535_v12 = vshrl.u32 %v4580_v52, %v1534_v17  ;;  %v1545_v24 = vshll.u32 %v4572_v13, %v1533_v44 }
 0x2bd   : > { %v1546_v57 = vshrl.u32 %v4624_v60, %v1534_v17  ;;  %v1549_v40 = vshrl.u32 %v4625_v23, %v1534_v17  ;;  %v1470_v22 = vmul.u32 %v3814_v10, %v1454_v20  ;;  %v1548_v7 = vshll.u32 %v4624_v60, %v1533_v44 }
 0x2be   : > { %v1544_v46 = vor.u32 %v1543_v45, %v1542_v28  ;;  %vm1551_vm12 = vcmp.lt.s32.totalorder %v3816_v5, 1  ;;  %vm1472_vm0 = vc.u32 %v3846_v4, %v3849_v61  ;;  %v1473_v33 = vadd.s32 1, %v3850_v6 }
 0x2bf   : > { %v1547_v58 = vor.u32 %v1546_v57, %v1545_v24  ;;  %vm1552_vm1 = vcmp.lt.s32.totalorder %v3816_v5, 2  ;;  %v1550_v11 = vor.u32 %v1549_v40, %v1548_v7  ;;  %vm1553_vm6 = vcmp.lt.s32.totalorder %v3816_v5, 3 }
 0x2c0   : > { %vm1554_vm3 = vcmp.lt.s32.totalorder %v3816_v5, 4  ;;  %v1559_v30 = vsel %vm1551_vm12, %v1538_v54, %v1541_v15  ;;  %v1474_v10 = vsel %vm1472_vm0, %v1473_v33, %v3850_v6  ;;  %v1563_v53 = vsel %vm1551_vm12, %v1541_v15, %v1544_v46 }
 0x2c1   : > { %v1556_v18 = vsel %vm1554_vm3, %v1544_v46, 2102212464  ;;  %v1560_v44 = vsel %vm1554_vm3, %v1547_v58, 920167782  ;;  %v1475_v8 = vadd.s32 %v1474_v10, %v1470_v22  ;;  %v1555_v32 = vsel %vm1551_vm12, %v1535_v12, %v1538_v54 }
 0x2c2   : > { %v1561_v17 = vsel %vm1553_vm6, %v1544_v46, %v1560_v44  ;;  %v1564_v59 = vsel %vm1554_vm3, %v1550_v11, 1326507024  ;;  %v1557_v42 = vsel %vm1553_vm6, %v1541_v15, %v1556_v18  ;;  %vm1634_vm7 = vcmp.gt.s32.totalorder %v3822_v9, 0 }
 0x2c3   : > { %v1562_v21 = vsel %vm1552_vm1, %v1559_v30, %v1561_v17  ;;  %v1565_v36 = vsel %vm1553_vm6, %v1547_v58, %v1564_v59  ;;  %v1476_v39 = vadd.s32 536870912, %v1475_v8  ;;  %v1630_v38 = vand.u32 8388607, %v4555_v1 }
 0x2c4   : > { %v1566_v43 = vsel %vm1552_vm1, %v1563_v53, %v1565_v36  ;;  %v3875_v25 = vmul.u32.u64.low %v3818_v34, %v1562_v21  ;;  %v3876_v29 = vmul.u32.u64.high %v3818_v34, %v1562_v21, %v3875_v25  ;;  %v1635_v31 = vsel %vm1634_vm7, %v3822_v9, 0 }
 0x2c5   : > { %v3880_v47 = vmul.u32.u64.low %v3818_v34, %v1566_v43  ;;  %v3881_v16 = vmul.u32.u64.high %v3818_v34, %v1566_v43, %v3880_v47  ;;  %v3886_v19 = vshrl.u32 %v1476_v39, 30  ;;  %v1558_v48 = vsel %vm1552_vm1, %v1555_v32, %v1557_v42 }
 0x2c6   : > { %v1637_v20 = vand.u32 31, %v1635_v31  ;;  %v1730_v49 = vand.u32 2139095040, %v3810_v26  ;;  %v1577_v0 = vadd.s32 1, %v3876_v29  ;;  %v1574_v6 = vmul.u32 %v3818_v34, %v1558_v48 }
 0x2c7   : > { %v1478_v3 = vshll.u32 %v3886_v19, 30  ;;  %vm1576_vm8 = vc.u32 %v3881_v16, %v3875_v25  ;;  %v1631_v54 = vor.u32 8388608, %v1630_v38  ;;  %v1636_v40 = vshrl.u32 %v1635_v31, 5 }
 0x2c8   : > { %v1638_v35 = vsub.s32 32, %v1637_v20  ;;  %v1578_v15 = vsel %vm1576_vm8, %v1577_v0, %v3876_v29  ;;  %v1731_v5 = vshrl.u32 %v1730_v49, 23  ;;  %v1640_v45 = vshll.u32 %v4580_v52, %v1637_v20 }
 0x2c9   : > { %v3896_v9 = vsub.s32 %v1475_v8, %v1478_v3  ;;  %v1579_v28 = vadd.s32 %v1578_v15, %v1574_v6  ;;  %v1643_v34 = vshll.u32 %v4577_v14, %v1637_v20  ;;  %v1646_v33 = vshll.u32 %v4578_v41, %v1637_v20 }
 0x2ca   : > { %v1641_v12 = vshrl.u32 %v4577_v14, %v1638_v35  ;;  %v1644_v24 = vshrl.u32 %v4578_v41, %v1638_v35  ;;  %v1647_v22 = vshrl.u32 %v4572_v13, %v1638_v35  ;;  %v1671_v58 = vshll.u32 %v1631_v54, 8 }
 0x2cb   : > { %v1481_v57 = vsub.s32 0, %v3896_v9  ;;  %v1580_v46 = vadd.s32 536870912, %v1579_v28  ;;  %v1649_v10 = vshll.u32 %v4572_v13, %v1637_v20  ;;  %v1650_v18 = vshrl.u32 %v4624_v60, %v1638_v35 }
 0x2cc   : > { %v1642_v7 = vor.u32 %v1641_v12, %v1640_v45  ;;  %v1645_v30 = vor.u32 %v1644_v24, %v1643_v34  ;;  %v1648_v53 = vor.u32 %v1647_v22, %v1646_v33  ;;  %v1652_v8 = vshll.u32 %v4624_v60, %v1637_v20 }
 0x2cd   : > { %v2478_v11 = vmin.u32 %v1481_v57, %v3896_v9  ;;  %v3909_v44 = vshrl.u32 %v1580_v46, 30  ;;  %v1653_v32 = vshrl.u32 %v4625_v23, %v1638_v35  ;;  %v1651_v59 = vor.u32 %v1650_v18, %v1649_v10 }
 0x2ce   : > { %vm1655_vm9 = vcmp.lt.s32.totalorder %v1636_v40, 1  ;;  %v2489_v42 = vadd.s32 4294967169, %v1731_v5  ;;  %vm1656_vm11 = vcmp.lt.s32.totalorder %v1636_v40, 2  ;;  %vm1658_vm10 = vcmp.lt.s32.totalorder %v1636_v40, 4 }
 0x2cf   : > { %v1483_v17 = vclz %v2478_v11  ;;  %v1582_v21 = vshll.u32 %v3909_v44, 30  ;;  %v1654_v36 = vor.u32 %v1653_v32, %v1652_v8  ;;  %vm1657_vm14 = vcmp.lt.s32.totalorder %v1636_v40, 3 }
 0x2d0   : > { %v1663_v43 = vsel %vm1655_vm9, %v1642_v7, %v1645_v30  ;;  %v1664_v29 = vsel %vm1658_vm10, %v1651_v59, 920167782  ;;  %v1660_v38 = vsel %vm1658_vm10, %v1648_v53, 2102212464  ;;  %v1667_v48 = vsel %vm1655_vm9, %v1645_v30, %v1648_v53 }
 0x2d1   : > { %v2479_v39 = vadd.s32 4294967294, %v1483_v17  ;;  %v3915_v47 = vsub.s32 %v1579_v28, %v1582_v21  ;;  %v1665_v31 = vsel %vm1657_vm14, %v1648_v53, %v1664_v29  ;;  %v1639_v20 = vshrl.u32 %v4580_v52, %v1638_v35 }
 0x2d2   : > { %v1666_v49 = vsel %vm1656_vm11, %v1663_v43, %v1665_v31  ;;  %v1668_v3 = vsel %vm1658_vm10, %v1654_v36, 1326507024  ;;  %v1737_v15 = vadd.s32 1, %v2489_v42  ;;  %v1661_v45 = vsel %vm1657_vm14, %v1645_v30, %v1660_v38  ;;  %v1306_v43 = vpop.permute.xlu0 %1305 }
 0x2d3   : > { %vm2480_vm2 = vcmp.lt.s32.totalorder %v2479_v39, 0  ;;  %v1585_v6 = vsub.s32 0, %v3915_v47  ;;  %v1669_v54 = vsel %vm1657_vm14, %v1651_v59, %v1668_v3  ;;  %v1659_v28 = vsel %vm1655_vm9, %v1639_v20, %v1642_v7 }
 0x2d4   : > { %v1486_v0 = vsel %vm2480_vm2, 0, %v2479_v39  ;;  %v1670_v12 = vsel %vm1656_vm11, %v1667_v48, %v1669_v54  ;;  %vm1738_vm4 = vcmp.gt.s32.totalorder %v1737_v15, 0  ;;  %v4554_v33 = vand.u32 2147483647, %v3810_v26 }
 0x2d5   : > { %v1491_v5 = vsub.s32 4294967266, %v1486_v0  ;;  %v2482_v24 = vmin.u32 %v1585_v6, %v3915_v47  ;;  %v3927_v57 = vmul.u32.u64.low %v1671_v58, %v1670_v12  ;;  %v3928_v35 = vmul.u32.u64.high %v1671_v58, %v1670_v12, %v3927_v57 }
 0x2d6   : > { %v3930_v34 = vmul.u32.u64.low %v1671_v58, %v1666_v49  ;;  %v3931_v22 = vmul.u32.u64.high %v1671_v58, %v1666_v49, %v3930_v34  ;;  %v1739_v11 = vsel %vm1738_vm4, %v1737_v15, 0  ;;  %v1487_v10 = vsub.s32 32, %v1486_v0 }
 0x2d7   : > { %v1587_v46 = vclz %v2482_v24  ;;  %v1492_v7 = vadd.s32 127, %v1491_v5  ;;  %v1662_v30 = vsel %vm1656_vm11, %v1659_v28, %v1661_v45  ;;  %v1741_v18 = vand.u32 31, %v1739_v11 }
 0x2d8   : > { %vm1680_vm5 = vc.u32 %v3928_v35, %v3930_v34  ;;  %v1471_v8 = vadd.s32 %v3849_v61, %v3846_v4  ;;  %v1681_v32 = vadd.s32 1, %v3931_v22  ;;  %v1678_v17 = vmul.u32 %v1671_v58, %v1662_v30 }
 0x2d9   : > { %v2483_v53 = vadd.s32 4294967294, %v1587_v46  ;;  %v1734_v59 = vand.u32 8388607, %v4554_v33  ;;  %v1493_v21 = vshll.u32 %v1492_v7, 23  ;;  %v1742_v36 = vsub.s32 32, %v1741_v18 }
 0x2da   : > { %v1489_v42 = vshrl.u32 %v1471_v8, %v1487_v10  ;;  %v1682_v40 = vsel %vm1680_vm5, %v1681_v32, %v3931_v22  ;;  %v1488_v29 = vshll.u32 %v3896_v9, %v1486_v0  ;;  %v3946_v4 = vadd.f32 %v3804_v37, %v1306_v43 }
 0x2db   : > { %vm2484_vm15 = vcmp.lt.s32.totalorder %v2483_v53, 0  ;;  %v1683_v39 = vadd.s32 %v1682_v40, %v1678_v17  ;;  %v1735_v48 = vor.u32 8388608, %v1734_v59  ;;  %v1494_v58 = vor.u32 4788187, %v1493_v21 }
 0x2dc   : > { %v1590_v38 = vsel %vm2484_vm15, 0, %v2483_v53  ;;  %v1490_v61 = vor.u32 %v1489_v42, %v1488_v29  ;;  %v1745_v20 = vshrl.u32 %v4577_v14, %v1742_v36  ;;  %v1748_v49 = vshrl.u32 %v4578_v41, %v1742_v36 }
 0x2dd   : > { %v1684_v31 = vadd.s32 536870912, %v1683_v39  ;;  %v1595_v3 = vsub.s32 4294967266, %v1590_v38  ;;  %v1751_v54 = vshrl.u32 %v4572_v13, %v1742_v36  ;;  %v1754_v15 = vshrl.u32 %v4624_v60, %v1742_v36 }
 0x2de   : > { %v1744_v9 = vshll.u32 %v4580_v52, %v1741_v18  ;;  %v1747_v0 = vshll.u32 %v4577_v14, %v1741_v18  ;;  %v1753_v37 = vshll.u32 %v4572_v13, %v1741_v18  ;;  %v1757_v5 = vshrl.u32 %v4625_v23, %v1742_v36 }
 0x2df   : > { %v3950_v6 = vshrl.u32 %v1684_v31, 30  ;;  %v1740_v45 = vshrl.u32 %v1739_v11, 5  ;;  %v1750_v12 = vshll.u32 %v4578_v41, %v1741_v18  ;;  %v3961_v24 = vadd.f32 %v3806_v50, %v1306_v43 }
 0x2e0   : > { %v1746_v57 = vor.u32 %v1745_v20, %v1744_v9  ;;  %v1749_v22 = vor.u32 %v1748_v49, %v1747_v0  ;;  %v1755_v46 = vor.u32 %v1754_v15, %v1753_v37  ;;  %v1756_v10 = vshll.u32 %v4624_v60, %v1741_v18 }
 0x2e1   : > { %v1686_v28 = vshll.u32 %v3950_v6, 30  ;;  %v1575_v7 = vadd.s32 %v3875_v25, %v3881_v16  ;;  %v1596_v30 = vadd.s32 127, %v1595_v3  ;;  %v1752_v8 = vor.u32 %v1751_v54, %v1750_v12 }
 0x2e2   : > { %v1495_v32 = vand.u32 2147483647, %v1494_v58  ;;  %v1497_v17 = vcvt.s32.f32 %v1490_v61  ;;  %v1758_v11 = vor.u32 %v1757_v5, %v1756_v10  ;;  %v1775_v59 = vshll.u32 %v1735_v48, 8 }
 0x2e3   : > { %v3966_v53 = vsub.s32 %v1683_v39, %v1686_v28  ;;  %v1591_v42 = vsub.s32 32, %v1590_v38  ;;  %vm1759_vm12 = vcmp.lt.s32.totalorder %v1740_v45, 1  ;;  %vm1762_vm0 = vcmp.lt.s32.totalorder %v1740_v45, 4 }
 0x2e4   : > { %v1743_v21 = vshrl.u32 %v4580_v52, %v1742_v36  ;;  %vm1761_vm1 = vcmp.lt.s32.totalorder %v1740_v45, 3  ;;  %v1767_v18 = vsel %vm1759_vm12, %v1746_v57, %v1749_v22  ;;  %v1768_v40 = vsel %vm1762_vm0, %v1755_v46, 920167782 }
 0x2e5   : > { %v1689_v50 = vsub.s32 0, %v3966_v53  ;;  %v1597_v25 = vshll.u32 %v1596_v30, 23  ;;  %vm1760_vm6 = vcmp.lt.s32.totalorder %v1740_v45, 2  ;;  %v1764_v16 = vsel %vm1762_vm0, %v1752_v8, 2102212464 }
 0x2e6   : > { %v1769_v39 = vsel %vm1761_vm1, %v1752_v8, %v1768_v40  ;;  %v1771_v31 = vsel %vm1759_vm12, %v1749_v22, %v1752_v8  ;;  %v1772_v48 = vsel %vm1762_vm0, %v1758_v11, 1326507024  ;;  %v1592_v61 = vshll.u32 %v3915_v47, %v1590_v38 }
 0x2e7   : > { %v2486_v43 = vmin.u32 %v1689_v50, %v3966_v53  ;;  %v1770_v29 = vsel %vm1760_vm6, %v1767_v18, %v1769_v39  ;;  %v1593_v58 = vshrl.u32 %v1575_v7, %v1591_v42  ;;  %v1763_v36 = vsel %vm1759_vm12, %v1743_v21, %v1746_v57  ;;  %v4001_v39 = vpop.permute.xlu1 %1310 }
 0x2e8   : > { %v1773_v20 = vsel %vm1761_vm1, %v1755_v46, %v1772_v48  ;;  %v1765_v49 = vsel %vm1761_vm1, %v1749_v22, %v1764_v16  ;;  %v3977_v54 = vmul.u32.u64.low %v1775_v59, %v1770_v29  ;;  %v3978_v15 = vmul.u32.u64.high %v1775_v59, %v1770_v29, %v3977_v54 }
 0x2e9   : > { %v1774_v3 = vsel %vm1760_vm6, %v1771_v31, %v1773_v20  ;;  %v1498_v9 = vmul.f32 %v1497_v17, %v1495_v32  ;;  %v1598_v0 = vor.u32 4788187, %v1597_v25  ;;  %v1691_v28 = vclz %v2486_v43 }
 0x2ea   : > { %v3981_v37 = vmul.u32.u64.low %v1775_v59, %v1774_v3  ;;  %v3982_v5 = vmul.u32.u64.high %v1775_v59, %v1774_v3, %v3981_v37  ;;  %v1834_v12 = vand.u32 2139095040, %v3946_v4  ;;  %v1594_v47 = vor.u32 %v1593_v58, %v1592_v61 }
 0x2eb   : > { %v1766_v38 = vsel %vm1760_vm6, %v1763_v36, %v1765_v49  ;;  %v1938_v57 = vand.u32 2139095040, %v3961_v24  ;;  %v1785_v22 = vadd.s32 1, %v3978_v15  ;;  %v1499_v10 = vxor.u32 2147483648, %v1498_v9 }
 0x2ec   : > { %v1835_v46 = vshrl.u32 %v1834_v12, 23  ;;  %v1501_v7 = vsub.s32 4, %v3886_v19  ;;  %v1599_v30 = vand.u32 2147483647, %v1598_v0  ;;  %v4553_v8 = vand.u32 2147483647, %v3946_v4 }
 0x2ed   : > { %v2487_v32 = vadd.s32 4294967294, %v1691_v28  ;;  %v1782_v17 = vmul.u32 %v1775_v59, %v1766_v38  ;;  %vm1784_vm3 = vc.u32 %v3982_v5, %v3977_v54  ;;  %v1601_v42 = vcvt.s32.f32 %v1594_v47 }
 0x2ee   : > { %v2493_v11 = vadd.s32 4294967169, %v1835_v46  ;;  %v1786_v45 = vsel %vm1784_vm3, %v1785_v22, %v3978_v15  ;;  %v1939_v50 = vshrl.u32 %v1938_v57, 23  ;;  %vm1417_vm7 = vcmp.lt.s32.totalorder %v3789_v63, 0 }
 0x2ef   : > { %v1787_v21 = vadd.s32 %v1786_v45, %v1782_v17  ;;  %v1500_v40 = vsel %vm1417_vm7, %v1499_v10, %v1498_v9  ;;  %v3995_v25 = vsel %vm1417_vm7, %v1501_v7, %v3886_v19  ;;  %v3997_v16 = vmul.f32 %v1601_v42, %v1599_v30 }
 0x2f0   : > { %v1841_v18 = vadd.s32 1, %v2493_v11  ;;  %v1838_v59 = vand.u32 8388607, %v4553_v8  ;;  %vm2488_vm8 = vcmp.lt.s32.totalorder %v2487_v32, 0  ;;  %v2497_v29 = vadd.s32 4294967169, %v1939_v50 }
 0x2f1   : > { %v1788_v43 = vadd.s32 536870912, %v1787_v21  ;;  %vm4005_vm11 = vcmp.le.f32.partialorder %v1415_v2, 0.7853982  ;;  %v4011_v19 = vadd.f32 %v3808_v55, %v4001_v39  ;;  %v4018_v58 = vadd.s32 %v3930_v34, %v3928_v35 }
 0x2f2   : > { %vm1842_vm9 = vcmp.gt.s32.totalorder %v1841_v18, 0  ;;  %v4025_v2 = vsel %vm4005_vm11, %v3789_v63, %v1500_v40  ;;  %v1603_v49 = vxor.u32 2147483648, %v3997_v16  ;;  %v4028_v55 = vsel %vm2488_vm8, 0, %v2487_v32 }
 0x2f3   : > { %v1843_v48 = vsel %vm1842_vm9, %v1841_v18, 0  ;;  %v4020_v36 = vshrl.u32 %v1788_v43, 30  ;;  %v1839_v9 = vor.u32 8388608, %v1838_v59  ;;  %v1945_v35 = vadd.s32 1, %v2497_v29 }
 0x2f4   : > { %v1845_v20 = vand.u32 31, %v1843_v48  ;;  %v1844_v34 = vshrl.u32 %v1843_v48, 5  ;;  %v4552_v42 = vand.u32 2147483647, %v3961_v24  ;;  %vm1521_vm10 = vcmp.lt.s32.totalorder %v3791_v62, 0 }
 0x2f5   : > { %v1790_v15 = vshll.u32 %v4020_v36, 30  ;;  %v1699_v45 = vsub.s32 4294967266, %v4028_v55  ;;  %v1879_v59 = vshll.u32 %v1839_v9, 8  ;;  %vm1946_vm2 = vcmp.gt.s32.totalorder %v1945_v35, 0 }
 0x2f6   : > { %v1846_v0 = vsub.s32 32, %v1845_v20  ;;  %v1848_v37 = vshll.u32 %v4580_v52, %v1845_v20  ;;  %v1851_v28 = vshll.u32 %v4577_v14, %v1845_v20  ;;  %v1854_v12 = vshll.u32 %v4578_v41, %v1845_v20 }
 0x2f7   : > { %v4035_v47 = vsub.s32 %v1787_v21, %v1790_v15  ;;  %v1857_v22 = vshll.u32 %v4572_v13, %v1845_v20  ;;  %v1860_v7 = vshll.u32 %v4624_v60, %v1845_v20  ;;  %vm1863_vm14 = vcmp.lt.s32.totalorder %v1844_v34, 1 }
 0x2f8   : > { %v1849_v38 = vshrl.u32 %v4577_v14, %v1846_v0  ;;  %v1852_v57 = vshrl.u32 %v4578_v41, %v1846_v0  ;;  %v1855_v46 = vshrl.u32 %v4572_v13, %v1846_v0  ;;  %v1858_v10 = vshrl.u32 %v4624_v60, %v1846_v0 }
 0x2f9   : > { %v1861_v30 = vshrl.u32 %v4625_v23, %v1846_v0  ;;  %v1793_v32 = vsub.s32 0, %v4035_v47  ;;  %v1847_v43 = vshrl.u32 %v4580_v52, %v1846_v0  ;;  %vm1864_vm4 = vcmp.lt.s32.totalorder %v1844_v34, 2 }
 0x2fa   : > { %v1850_v17 = vor.u32 %v1849_v38, %v1848_v37  ;;  %v1853_v11 = vor.u32 %v1852_v57, %v1851_v28  ;;  %v1856_v50 = vor.u32 %v1855_v46, %v1854_v12  ;;  %v1859_v21 = vor.u32 %v1858_v10, %v1857_v22 }
 0x2fb   : > { %v1862_v18 = vor.u32 %v1861_v30, %v1860_v7  ;;  %v2490_v40 = vmin.u32 %v1793_v32, %v4035_v47  ;;  %vm1866_vm5 = vcmp.lt.s32.totalorder %v1844_v34, 4  ;;  %vm1865_vm15 = vcmp.lt.s32.totalorder %v1844_v34, 3 }
 0x2fc   : > { %v1871_v29 = vsel %vm1863_vm14, %v1850_v17, %v1853_v11  ;;  %v1868_v20 = vsel %vm1866_vm5, %v1856_v50, 2102212464  ;;  %v1872_v15 = vsel %vm1866_vm5, %v1859_v21, 920167782  ;;  %v1867_v37 = vsel %vm1863_vm14, %v1847_v43, %v1850_v17 }
 0x2fd   : > { %v1795_v48 = vclz %v2490_v40  ;;  %v1873_v28 = vsel %vm1865_vm15, %v1856_v50, %v1872_v15  ;;  %v1875_v38 = vsel %vm1863_vm14, %v1853_v11, %v1856_v50  ;;  %v1876_v12 = vsel %vm1866_vm5, %v1862_v18, 1326507024 }
 0x2fe   : > { %v1869_v22 = vsel %vm1865_vm15, %v1853_v11, %v1868_v20  ;;  %v1874_v46 = vsel %vm1864_vm4, %v1871_v29, %v1873_v28  ;;  %v1877_v10 = vsel %vm1865_vm15, %v1859_v21, %v1876_v12  ;;  %v1700_v9 = vadd.s32 127, %v1699_v45 }
 0x2ff   : > { %v2491_v57 = vadd.s32 4294967294, %v1795_v48  ;;  %v1878_v7 = vsel %vm1864_vm4, %v1875_v38, %v1877_v10  ;;  %v4052_v0 = vmul.u32.u64.low %v1879_v59, %v1874_v46  ;;  %v4053_v30 = vmul.u32.u64.high %v1879_v59, %v1874_v46, %v4052_v0 }
 0x300   : > { %v4056_v32 = vmul.u32.u64.low %v1879_v59, %v1878_v7  ;;  %v4057_v40 = vmul.u32.u64.high %v1879_v59, %v1878_v7, %v4056_v32  ;;  %v1947_v17 = vsel %vm1946_vm2, %v1945_v35, 0  ;;  %v1870_v11 = vsel %vm1864_vm4, %v1867_v37, %v1869_v22 }
 0x301   : > { %vm2492_vm12 = vcmp.lt.s32.totalorder %v2491_v57, 0  ;;  %v1942_v21 = vand.u32 8388607, %v4552_v42  ;;  %v1949_v45 = vand.u32 31, %v1947_v17  ;;  %v4068_v18 = vsel %vm1521_vm10, %v1603_v49, %v3997_v16 }
 0x302   : > { %v4060_v50 = vsel %vm2492_vm12, 0, %v2491_v57  ;;  %v1695_v43 = vsub.s32 32, %v4028_v55  ;;  %v2042_v48 = vand.u32 2139095040, %v4011_v19  ;;  %v1889_v20 = vadd.s32 1, %v4053_v30 }
 0x303   : > { %v1803_v34 = vsub.s32 4294967266, %v4060_v50  ;;  %v1950_v15 = vsub.s32 32, %v1949_v45  ;;  %v1701_v37 = vshll.u32 %v1700_v9, 23  ;;  %v1783_v28 = vadd.s32 %v3977_v54, %v3982_v5 }
 0x304   : > { %v1886_v16 = vmul.u32 %v1879_v59, %v1870_v11  ;;  %vm1888_vm0 = vc.u32 %v4057_v40, %v4052_v0  ;;  %v1943_v38 = vor.u32 8388608, %v1942_v21  ;;  %v1799_v22 = vsub.s32 32, %v4060_v50 }
 0x305   : > { %v1890_v49 = vsel %vm1888_vm0, %v1889_v20, %v4053_v30  ;;  %v1953_v12 = vshrl.u32 %v4577_v14, %v1950_v15  ;;  %v1956_v57 = vshrl.u32 %v4578_v41, %v1950_v15  ;;  %v1948_v10 = vshrl.u32 %v1947_v17, 5 }
 0x306   : > { %v1891_v46 = vadd.s32 %v1890_v49, %v1886_v16  ;;  %v2043_v7 = vshrl.u32 %v2042_v48, 23  ;;  %v1804_v9 = vadd.s32 127, %v1803_v34  ;;  %v1952_v32 = vshll.u32 %v4580_v52, %v1949_v45 }
 0x307   : > { %v1955_v54 = vshll.u32 %v4577_v14, %v1949_v45  ;;  %v1959_v5 = vshrl.u32 %v4572_v13, %v1950_v15  ;;  %v1958_v30 = vshll.u32 %v4578_v41, %v1949_v45  ;;  %v1961_v11 = vshll.u32 %v4572_v13, %v1949_v45 }
 0x308   : > { %v1892_v59 = vadd.s32 536870912, %v1891_v46  ;;  %v1962_v21 = vshrl.u32 %v4624_v60, %v1950_v15  ;;  %vm4093_vm1 = vcmp.le.f32.partialorder %v1519_v56, 0.7853982  ;;  %v1954_v17 = vor.u32 %v1953_v12, %v1952_v32 }
 0x309   : > { %v1957_v48 = vor.u32 %v1956_v57, %v1955_v54  ;;  %v1964_v34 = vshll.u32 %v4624_v60, %v1949_v45  ;;  %v1965_v16 = vshrl.u32 %v4625_v23, %v1950_v15  ;;  %v1697_v49 = vshrl.u32 %v4018_v58, %v1695_v43 }
 0x30a   : > { %v4100_v42 = vshrl.u32 %v1892_v59, 30  ;;  %v1960_v8 = vor.u32 %v1959_v5, %v1958_v30  ;;  %v1963_v61 = vor.u32 %v1962_v21, %v1961_v11  ;;  %v1702_v33 = vor.u32 4788187, %v1701_v37 }
 0x30b   : > { %v1966_v1 = vor.u32 %v1965_v16, %v1964_v34  ;;  %v1983_v3 = vshll.u32 %v1943_v38, 8  ;;  %v2501_v29 = vadd.s32 4294967169, %v2043_v7  ;;  %v1805_v56 = vshll.u32 %v1804_v9, 23 }
 0x30c   : > { %v1894_v35 = vshll.u32 %v4100_v42, 30  ;;  %vm1967_vm6 = vcmp.lt.s32.totalorder %v1948_v10, 1  ;;  %vm1970_vm3 = vcmp.lt.s32.totalorder %v1948_v10, 4  ;;  %vm1625_vm7 = vcmp.lt.s32.totalorder %v3797_v51, 0 }
 0x30d   : > { %v1800_v45 = vshll.u32 %v4035_v47, %v4060_v50  ;;  %v1801_v12 = vshrl.u32 %v1783_v28, %v1799_v22  ;;  %v1975_v58 = vsel %vm1967_vm6, %v1954_v17, %v1957_v48  ;;  %v1976_v43 = vsel %vm1970_vm3, %v1963_v61, 920167782 }
 0x30e   : > { %v4107_v57 = vsub.s32 %v1891_v46, %v1894_v35  ;;  %v1951_v37 = vshrl.u32 %v4580_v52, %v1950_v15  ;;  %vm1969_vm8 = vcmp.lt.s32.totalorder %v1948_v10, 3  ;;  %v1972_v38 = vsel %vm1970_vm3, %v1960_v8, 2102212464 }
 0x30f   : > { %vm1968_vm9 = vcmp.lt.s32.totalorder %v1948_v10, 2  ;;  %v1977_v7 = vsel %vm1969_vm8, %v1960_v8, %v1976_v43  ;;  %v1979_v9 = vsel %vm1967_vm6, %v1957_v48, %v1960_v8  ;;  %v1980_v32 = vsel %vm1970_vm3, %v1966_v1, 1326507024 }
 0x310   : > { %v1806_v54 = vor.u32 4788187, %v1805_v56  ;;  %v1897_v5 = vsub.s32 0, %v4107_v57  ;;  %v1971_v47 = vsel %vm1967_vm6, %v1951_v37, %v1954_v17  ;;  %v1978_v50 = vsel %vm1968_vm9, %v1975_v58, %v1977_v7 }
 0x311   : > { %v1973_v28 = vsel %vm1969_vm8, %v1957_v48, %v1972_v38  ;;  %v1981_v22 = vsel %vm1969_vm8, %v1963_v61, %v1980_v32  ;;  %v4114_v35 = vmul.u32.u64.low %v1983_v3, %v1978_v50  ;;  %v4115_v46 = vmul.u32.u64.high %v1983_v3, %v1978_v50, %v4114_v35 }
 0x312   : > { %v1607_v15 = vsel %vm4093_vm1, %v3791_v62, %v4068_v18  ;;  %v2494_v1 = vmin.u32 %v1897_v5, %v4107_v57  ;;  %v1982_v8 = vsel %vm1968_vm9, %v1979_v9, %v1981_v22  ;;  %v2049_v59 = vadd.s32 1, %v2501_v29 }
 0x313   : > { %v4630_v30 = vshll.u32 %v3966_v53, %v4028_v55  ;;  %v1802_v21 = vor.u32 %v1801_v12, %v1800_v45  ;;  %v4127_v61 = vmul.u32.u64.low %v1983_v3, %v1982_v8  ;;  %v4128_v17 = vmul.u32.u64.high %v1983_v3, %v1982_v8, %v4127_v61 }
 0x314   : > { %v1703_v48 = vand.u32 2147483647, %v1702_v33  ;;  %v1899_v34 = vclz %v2494_v1  ;;  %v1974_v16 = vsel %vm1968_vm9, %v1971_v47, %v1973_v28  ;;  %vm2050_vm14 = vcmp.gt.s32.totalorder %v2049_v59, 0 }
 0x315   : > { %v1698_v11 = vor.u32 %v1697_v49, %v4630_v30  ;;  %v1807_v56 = vand.u32 2147483647, %v1806_v54  ;;  %v1993_v18 = vadd.s32 1, %v4115_v46  ;;  %v4631_v58 = vand.u32 2147483647, %v4011_v19 }
 0x316   : > { %v2051_v29 = vsel %vm2050_vm14, %v2049_v59, 0  ;;  %2694 = vcosq.f32 %v1607_v15  ;;  %v4632_v53 = vsub.s32 4, %v3950_v6  ;;  %v2495_v33 = vadd.s32 4294967294, %v1899_v34 }
 0x317   : > { %v2046_v43 = vand.u32 8388607, %v4631_v58  ;;  %v2053_v49 = vand.u32 31, %v2051_v29  ;;  %v1705_v10 = vcvt.s32.f32 %v1698_v11  ;;  %v1809_v45 = vcvt.s32.f32 %v1802_v21 }
 0x318   : > { %v4139_v55 = vsel %vm1625_vm7, %v4632_v53, %v3950_v6  ;;  %v1990_v12 = vmul.u32 %v1983_v3, %v1974_v16  ;;  %vm1992_vm2 = vc.u32 %v4128_v17, %v4114_v35  ;;  %2696 = vsinq.f32 %v1607_v15 }
 0x319   : > { %vm2496_vm4 = vcmp.lt.s32.totalorder %v2495_v33, 0  ;;  %v1994_v37 = vsel %vm1992_vm2, %v1993_v18, %v4115_v46  ;;  %v2054_v38 = vsub.s32 32, %v2053_v49  ;;  %v1706_v7 = vmul.f32 %v1705_v10, %v1703_v48 }
 0x31a   : > { %v4144_v9 = vmul.f32 %v1809_v45, %v1807_v56  ;;  %v1995_v32 = vadd.s32 %v1994_v37, %v1990_v12  ;;  %v2047_v54 = vor.u32 8388608, %v2046_v43  ;;  %v4146_v6 = vsel %vm2496_vm4, 0, %v2495_v33 }
 0x31b   : > { %v4148_v5 = vshrl.u32 %v2051_v29, 5  ;;  %v2062_v47 = vshll.u32 %v4578_v41, %v2053_v49  ;;  %v4153_v3 = vadd.f32 %v3812_v27, %v4001_v39  ;;  %v2057_v28 = vshrl.u32 %v4577_v14, %v2054_v38 }
 0x31c   : > { %v1996_v50 = vadd.s32 536870912, %v1995_v32  ;;  %v2060_v22 = vshrl.u32 %v4578_v41, %v2054_v38  ;;  %v2063_v46 = vshrl.u32 %v4572_v13, %v2054_v38  ;;  %v2056_v15 = vshll.u32 %v4580_v52, %v2053_v49 }
 0x31d   : > { %v2059_v1 = vshll.u32 %v4577_v14, %v2053_v49  ;;  %v2065_v8 = vshll.u32 %v4572_v13, %v2053_v49  ;;  %v2066_v59 = vshrl.u32 %v4624_v60, %v2054_v38  ;;  %v1707_v30 = vxor.u32 2147483648, %v1706_v7 }
 0x31e   : > { %v1811_v11 = vxor.u32 2147483648, %v4144_v9  ;;  %v4163_v27 = vshrl.u32 %v1996_v50, 30  ;;  %v2064_v39 = vor.u32 %v2063_v46, %v2062_v47  ;;  %v1907_v21 = vsub.s32 4294967266, %v4146_v6 }
 0x31f   : > { %v2058_v61 = vor.u32 %v2057_v28, %v2056_v15  ;;  %v2061_v48 = vor.u32 %v2060_v22, %v2059_v1  ;;  %v2067_v34 = vor.u32 %v2066_v59, %v2065_v8  ;;  %v4633_v16 = vand.u32 2147483647, %v3797_v51 }
 0x320   : > { %v1998_v18 = vshll.u32 %v4163_v27, 30  ;;  %v2068_v58 = vshll.u32 %v4624_v60, %v2053_v49  ;;  %v2069_v43 = vshrl.u32 %v4625_v23, %v2054_v38  ;;  %v2087_v29 = vshll.u32 %v2047_v54, 8  ;;  %v4175_v53 = vpop.eup %2694 }
 0x321   : > { %vm4168_vm5 = vcmp.le.f32.partialorder %v4633_v16, 0.7853982  ;;  %vm1729_vm15 = vcmp.lt.s32.totalorder %v3810_v26, 0  ;;  %v1903_v33 = vsub.s32 32, %v4146_v6  ;;  %v2055_v10 = vshrl.u32 %v4580_v52, %v2054_v38 }
 0x322   : > { %vm2074_vm12 = vcmp.lt.s32.totalorder %v4148_v5, 4  ;;  %v2146_v45 = vand.u32 2139095040, %v4153_v3  ;;  %v4182_v12 = vsub.s32 %v1995_v32, %v1998_v18  ;;  %v2070_v37 = vor.u32 %v2069_v43, %v2068_v58  ;;  %v4187_v54 = vpop.eup %2696 }
 0x323   : > { %vm2071_vm0 = vcmp.lt.s32.totalorder %v4148_v5, 1  ;;  %v2076_v49 = vsel %vm2074_vm12, %v2064_v39, 2102212464  ;;  %v1908_v47 = vadd.s32 127, %v1907_v21  ;;  %vm2073_vm6 = vcmp.lt.s32.totalorder %v4148_v5, 3 }
 0x324   : > { %v2079_v50 = vsel %vm2071_vm0, %v2058_v61, %v2061_v48  ;;  %v2080_v38 = vsel %vm2074_vm12, %v2067_v34, 920167782  ;;  %v4636_v28 = vand.u32 2147483647, %v3810_v26  ;;  %v2001_v22 = vsub.s32 0, %v4182_v12 }
 0x325   : > { %vm2072_vm8 = vcmp.lt.s32.totalorder %v4148_v5, 2  ;;  %v2081_v46 = vsel %vm2073_vm6, %v2064_v39, %v2080_v38  ;;  %v2083_v15 = vsel %vm2071_vm0, %v2061_v48, %v2064_v39  ;;  %v2075_v1 = vsel %vm2071_vm0, %v2055_v10, %v2058_v61 }
 0x326   : > { %vm4194_vm3 = vcmp.le.f32.partialorder %v4636_v28, 0.7853982  ;;  %v2077_v8 = vsel %vm2073_vm6, %v2061_v48, %v2076_v49  ;;  %v2082_v59 = vsel %vm2072_vm8, %v2079_v50, %v2081_v46  ;;  %v2084_v21 = vsel %vm2074_vm12, %v2070_v37, 1326507024 }
 0x327   : > { %v2498_v16 = vmin.u32 %v2001_v22, %v4182_v12  ;;  %v2085_v18 = vsel %vm2073_vm6, %v2067_v34, %v2084_v21  ;;  %v4205_v58 = vmul.u32.u64.low %v2087_v29, %v2082_v59  ;;  %v4206_v43 = vmul.u32.u64.high %v2087_v29, %v2082_v59, %v4205_v58 }
 0x328   : > { %v4639_v28 = vsel %vm4005_vm11, 0, %v3995_v25  ;;  %v1708_v39 = vsel %vm1625_vm7, %v1707_v30, %v1706_v7  ;;  %v2086_v61 = vsel %vm2072_vm8, %v2083_v15, %v2085_v18  ;;  %v2147_v48 = vshrl.u32 %v2146_v45, 23 }
 0x329   : > { %v4212_v38 = vadd.s32 3, %v4639_v28  ;;  %v1887_v10 = vadd.s32 %v4052_v0, %v4057_v40  ;;  %v2003_v34 = vclz %v2498_v16  ;;  %2698 = vcosq.f32 %v4025_v2 }
 0x32a   : > { %v4220_v37 = vmul.u32.u64.low %v2087_v29, %v2086_v61  ;;  %v4221_v49 = vmul.u32.u64.high %v2087_v29, %v2086_v61, %v4220_v37  ;;  %v1712_v25 = vsel %vm4168_vm5, 0, %v4139_v55  ;;  %v2078_v31 = vsel %vm2072_vm8, %v2075_v1, %v2077_v8 }
 0x32b   : > { %v2505_v7 = vadd.s32 4294967169, %v2147_v48  ;;  %v1812_v30 = vsel %vm1729_vm15, %v1811_v11, %v4144_v9  ;;  %v1905_v45 = vshrl.u32 %v1887_v10, %v1903_v33  ;;  %v1909_v0 = vshll.u32 %v1908_v47, 23 }
 0x32c   : > { %v2097_v40 = vadd.s32 1, %v4206_v43  ;;  %v1711_v50 = vsel %vm4168_vm5, %v3797_v51, %v1708_v39  ;;  %v2143_v22 = vand.u32 2147483647, %v4153_v3  ;;  %v1605_v55 = vsub.s32 4, %v3909_v44 }
 0x32d   : > { %v2153_v46 = vadd.s32 1, %v2505_v7  ;;  %v1904_v5 = vshll.u32 %v4107_v57, %v4146_v6  ;;  %v2499_v15 = vadd.s32 4294967294, %v2003_v34  ;;  %v2094_v1 = vmul.u32 %v2087_v29, %v2078_v31 }
 0x32e   : > { %vm2096_vm11 = vc.u32 %v4221_v49, %v4205_v58  ;;  %2700 = vsinq.f32 %v4025_v2  ;;  %v1815_v9 = vsel %vm4194_vm3, %v3810_v26, %v1812_v30  ;;  %v4248_v33 = vor.u32 4788187, %v1909_v0 }
 0x32f   : > { %v2098_v11 = vsel %vm2096_vm11, %v2097_v40, %v4206_v43  ;;  %vm2154_vm7 = vcmp.gt.s32.totalorder %v2153_v46, 0  ;;  %2702 = vcosq.f32 %v1711_v50  ;;  %v4246_v56 = vor.u32 %v1905_v45, %v1904_v5 }
 0x330   : > { %v2099_v47 = vadd.s32 %v2098_v11, %v2094_v1  ;;  %2704 = vsinq.f32 %v1711_v50  ;;  %v4250_v57 = vadd.s32 3, %v1712_v25  ;;  %v2150_v6 = vand.u32 8388607, %v2143_v22 }
 0x331   : > { %v2155_v2 = vsel %vm2154_vm7, %v2153_v46, 0  ;;  %2706 = vcosq.f32 %v1815_v9  ;;  %vm2500_vm9 = vcmp.lt.s32.totalorder %v2499_v15, 0  ;;  %v1606_v8 = vsel %vm1521_vm10, %v1605_v55, %v3909_v44 }
 0x332   : > { %v2100_v29 = vadd.s32 536870912, %v2099_v47  ;;  %2708 = vsinq.f32 %v1815_v9  ;;  %v4259_v59 = vadd.s32 %v4114_v35, %v4128_v17  ;;  %v2157_v21 = vand.u32 31, %v2155_v2 }
 0x333   : > { %v1616_v16 = vxor.u32 2147483648, %v4187_v54  ;;  %v1911_v18 = vand.u32 2147483647, %v4248_v33  ;;  %v1913_v43 = vcvt.s32.f32 %v4246_v56  ;;  %v1619_v39 = vxor.u32 2147483648, %v4175_v53  ;;  %v4267_v61 = vpop.eup %2698 }
 0x334   : > { %v4264_v28 = vshrl.u32 %v2100_v29, 30  ;;  %v4269_v48 = vsel %vm2500_vm9, 0, %v2499_v15  ;;  %v2151_v44 = vor.u32 8388608, %v2150_v6  ;;  %v2158_v10 = vsub.s32 32, %v2157_v21 }
 0x335   : > { %v1608_v35 = vsel %vm4093_vm1, 0, %v1606_v8  ;;  %v4274_v17 = vadd.s32 %v4205_v58, %v4221_v49  ;;  %v2160_v37 = vshll.u32 %v4580_v52, %v2157_v21  ;;  %v1813_v25 = vsub.s32 4, %v4020_v36 }
 0x336   : > { %v2102_v34 = vshll.u32 %v4264_v28, 30  ;;  %v2161_v31 = vshrl.u32 %v4577_v14, %v2158_v10  ;;  %v2163_v7 = vshll.u32 %v4577_v14, %v2157_v21  ;;  %v2164_v30 = vshrl.u32 %v4578_v41, %v2158_v10 }
 0x337   : > { %v2167_v45 = vshrl.u32 %v4572_v13, %v2158_v10  ;;  %v2011_v20 = vsub.s32 4294967266, %v4269_v48  ;;  %v2156_v58 = vshrl.u32 %v2155_v2, 5  ;;  %v2166_v49 = vshll.u32 %v4578_v41, %v2157_v21 }
 0x338   : > { %v4284_v0 = vsub.s32 %v2099_v47, %v2102_v34  ;;  %v4287_v40 = vpop.eup %2700  ;;  %v2007_v50 = vsub.s32 32, %v4269_v48  ;;  %v2162_v46 = vor.u32 %v2161_v31, %v2160_v37  ;;  %v2165_v55 = vor.u32 %v2164_v30, %v2163_v7 }
 0x339   : > { %v4290_v5 = vshll.u32 %v2151_v44, 8  ;;  %v4292_v14 = vpop.eup %2702  ;;  %v2168_v1 = vor.u32 %v2167_v45, %v2166_v49  ;;  %v2169_v9 = vshll.u32 %v4572_v13, %v2157_v21  ;;  %v2170_v11 = vshrl.u32 %v4624_v60, %v2158_v10 }
 0x33a   : > { %v2105_v15 = vsub.s32 0, %v4284_v0  ;;  %v4297_v47 = vpop.eup %2704  ;;  %v2172_v41 = vshll.u32 %v4624_v60, %v2157_v21  ;;  %v2173_v6 = vshrl.u32 %v4625_v23, %v2158_v10  ;;  %v1612_v2 = vadd.s32 3, %v1608_v35 }
 0x33b   : > { %v1814_v29 = vsel %vm1729_vm15, %v1813_v25, %v4020_v36  ;;  %v4304_v8 = vpop.eup %2706  ;;  %v2012_v44 = vadd.s32 127, %v2011_v20  ;;  %v2171_v37 = vor.u32 %v2170_v11, %v2169_v9  ;;  %vm2175_vm10 = vcmp.lt.s32.totalorder %v2156_v58, 1 }
 0x33c   : > { %v2502_v34 = vmin.u32 %v2105_v15, %v4284_v0  ;;  %v2709_v13 = vpop.eup %2708  ;;  %v2159_v31 = vshrl.u32 %v4580_v52, %v2158_v10  ;;  %v2174_v7 = vor.u32 %v2173_v6, %v2172_v41  ;;  %vm2178_vm1 = vcmp.lt.s32.totalorder %v2156_v58, 4 }
 0x33d   : > { %v2183_v60 = vsel %vm2175_vm10, %v2162_v46, %v2165_v55  ;;  %vm2177_vm14 = vcmp.lt.s32.totalorder %v2156_v58, 3  ;;  %v2180_v23 = vsel %vm2178_vm1, %v2168_v1, 2102212464  ;;  %v2184_v35 = vsel %vm2178_vm1, %v2171_v37, 920167782 }
 0x33e   : > { %v2107_v21 = vclz %v2502_v34  ;;  %vm2176_vm2 = vcmp.lt.s32.totalorder %v2156_v58, 2  ;;  %v2185_v30 = vsel %vm2177_vm14, %v2168_v1, %v2184_v35  ;;  %v2187_v36 = vsel %vm2175_vm10, %v2165_v55, %v2168_v1 }
 0x33f   : > { %v1613_v25 = vand.u32 3, %v1612_v2  ;;  %v2179_v20 = vsel %vm2175_vm10, %v2159_v31, %v2162_v46  ;;  %v2186_v49 = vsel %vm2176_vm2, %v2183_v60, %v2185_v30  ;;  %v2188_v15 = vsel %vm2178_vm1, %v2174_v7, 1326507024 }
 0x340   : > { %v2503_v45 = vadd.s32 4294967294, %v2107_v21  ;;  %v2181_v9 = vsel %vm2177_vm14, %v2165_v55, %v2180_v23  ;;  %v2189_v11 = vsel %vm2177_vm14, %v2171_v37, %v2188_v15  ;;  %v2008_v41 = vshll.u32 %v4182_v12, %v4269_v48 }
 0x341   : > { %v4310_v52 = vmul.u32.u64.low %v4290_v5, %v2186_v49  ;;  %v4311_v10 = vmul.u32.u64.high %v4290_v5, %v2186_v49, %v4310_v52  ;;  %v2190_v6 = vsel %vm2176_vm2, %v2187_v36, %v2189_v11  ;;  %v1816_v1 = vsel %vm4194_vm3, 0, %v1814_v29 }
 0x342   : > { %vm2504_vm4 = vcmp.lt.s32.totalorder %v2503_v45, 0  ;;  %v2009_v46 = vshrl.u32 %v4259_v59, %v2007_v50  ;;  %v4321_v55 = vmul.u32.u64.low %v4290_v5, %v2190_v6  ;;  %v4322_v34 = vmul.u32.u64.high %v4290_v5, %v2190_v6, %v4321_v55 }
 0x343   : > { %v2110_v2 = vsel %vm2504_vm4, 0, %v2503_v45  ;;  %vm1611_vm5 = vweird.f32 %v3791_v62  ;;  %vm1819_vm15 = vweird.f32 %v3810_v26  ;;  %v2013_v37 = vshll.u32 %v2012_v44, 23 }
 0x344   : > { %v2115_v31 = vsub.s32 4294967266, %v2110_v2  ;;  %v2182_v12 = vsel %vm2176_vm2, %v2179_v20, %v2181_v9  ;;  %v1824_v48 = vxor.u32 2147483648, %v2709_v13  ;;  %v2201_v7 = vadd.s32 1, %v4311_v10 }
 0x345   : > { %vm1615_vm12 = vcmp.eq.s32.totalorder %v1613_v25, 0  ;;  %vm1618_vm0 = vcmp.eq.s32.totalorder %v1613_v25, 2  ;;  %v1820_v32 = vadd.s32 3, %v1816_v1  ;;  %v1827_v44 = vxor.u32 2147483648, %v4304_v8 }
 0x346   : > { %v2116_v59 = vadd.s32 127, %v2115_v31  ;;  %v1617_v50 = vsel %vm1615_vm12, %v4175_v53, %v1616_v16  ;;  %v1620_v29 = vsel %vm1618_vm0, %v1619_v39, %v4187_v54  ;;  %v2010_v60 = vor.u32 %v2009_v46, %v2008_v41 }
 0x347   : > { %v2198_v58 = vmul.u32 %v4290_v5, %v2182_v12  ;;  %vm2200_vm6 = vc.u32 %v4322_v34, %v4310_v52  ;;  %v1821_v21 = vand.u32 3, %v1820_v32  ;;  %v2014_v23 = vor.u32 4788187, %v2013_v37 }
 0x348   : > { %v2111_v35 = vsub.s32 32, %v2110_v2  ;;  %v2202_v30 = vsel %vm2200_vm6, %v2201_v7, %v4311_v10  ;;  %vm1614_vm3 = vcmp.lt.s32.totalorder %v1613_v25, 2  ;;  %v2117_v53 = vshll.u32 %v2116_v59, 23 }
 0x349   : > { %v2203_v36 = vadd.s32 %v2202_v30, %v2198_v58  ;;  %v1621_v16 = vsel %vm1614_vm3, %v1617_v50, %v1620_v29  ;;  %vm1823_vm8 = vcmp.eq.s32.totalorder %v1821_v21, 0  ;;  %vm1826_vm11 = vcmp.eq.s32.totalorder %v1821_v21, 2 }
 0x34a   : > { %vm1822_vm7 = vcmp.lt.s32.totalorder %v1821_v21, 2  ;;  %v1825_v54 = vsel %vm1823_vm8, %v4304_v8, %v1824_v48  ;;  %v1828_v39 = vsel %vm1826_vm11, %v1827_v44, %v2709_v13  ;;  %v1509_v20 = vand.u32 3, %v4212_v38 }
 0x34b   : > { %v2204_v45 = vadd.s32 536870912, %v2203_v36  ;;  %v1829_v5 = vsel %vm1822_vm7, %v1825_v54, %v1828_v39  ;;  %v1512_v49 = vxor.u32 2147483648, %v4287_v40  ;;  %v2113_v15 = vshrl.u32 %v4274_v17, %v2111_v35 }
 0x34c   : > { %v1622_v25 = vsel %vm1611_vm5, nan, %v1621_v16  ;;  %v1830_v9 = vsel %vm1819_vm15, nan, %v1829_v5  ;;  %v1515_v11 = vxor.u32 2147483648, %v4267_v61  ;;  %v2112_v10 = vshll.u32 %v4284_v0, %v2110_v2 }
 0x34d   : > { %v4349_v8 = vshrl.u32 %v2204_v45, 30  ;;  %v2525_v13 = vpack.c.bf16 %v1830_v9, %v1622_v25  ;;  %vm1511_vm9 = vcmp.eq.s32.totalorder %v1509_v20, 0  ;;  %v2118_v41 = vor.u32 4788187, %v2117_v53 }
 0x34e   : > { %v1513_v38 = vsel %vm1511_vm9, %v4267_v61, %v1512_v49  ;;  %vm1514_vm10 = vcmp.eq.s32.totalorder %v1509_v20, 2  ;;  %v1717_v17 = vand.u32 3, %v4250_v57  ;;  %v1720_v6 = vxor.u32 2147483648, %v4297_v47 }
 0x34f   : > { %v2206_v62 = vshll.u32 %v4349_v8, 30  ;;  %2526 = vmatprep.subr.bf16.mxu0 %v2525_v13  ;;  %v1516_v26 = vsel %vm1514_vm10, %v1515_v11, %v4287_v40  ;;  %v1723_v1 = vxor.u32 2147483648, %v4292_v14  ;;  %v2015_v0 = vand.u32 2147483647, %v2014_v23 }
 0x350   : > { %v2114_v46 = vor.u32 %v2113_v15, %v2112_v10  ;;  %vm1510_vm1 = vcmp.lt.s32.totalorder %v1509_v20, 2  ;;  %vm1719_vm14 = vcmp.eq.s32.totalorder %v1717_v17, 0  ;;  %vm1722_vm2 = vcmp.eq.s32.totalorder %v1717_v17, 2 }
 0x351   : > { %v2207_v2 = vsub.s32 %v2203_v36, %v2206_v62  ;;  %v1517_v55 = vsel %vm1510_vm1, %v1513_v38, %v1516_v26  ;;  %v1721_v61 = vsel %vm1719_vm14, %v4292_v14, %v1720_v6  ;;  %v2017_v37 = vcvt.s32.f32 %v2010_v60 }
 0x352   : > { %v2119_v57 = vand.u32 2147483647, %v2118_v41  ;;  %vm1718_vm4 = vcmp.lt.s32.totalorder %v1717_v17, 2  ;;  %v1724_v31 = vsel %vm1722_vm2, %v1723_v1, %v4297_v47  ;;  %vm1507_vm5 = vweird.f32 %v3789_v63 }
 0x353   : > { %v2209_v12 = vsub.s32 0, %v2207_v2  ;;  %vm1715_vm15 = vweird.f32 %v3797_v51  ;;  %v1725_v40 = vsel %vm1718_vm4, %v1721_v61, %v1724_v31  ;;  %v1914_v48 = vmul.f32 %v1913_v43, %v1911_v18 }
 0x354   : > { %v2121_v7 = vcvt.s32.f32 %v2114_v46  ;;  %v1518_v32 = vsel %vm1507_vm5, nan, %v1517_v55  ;;  %v1726_v14 = vsel %vm1715_vm15, nan, %v1725_v40  ;;  %v2018_v59 = vmul.f32 %v2017_v37, %v2015_v0 }
 0x355   : > { %v2506_v50 = vmin.u32 %v2209_v12, %v2207_v2  ;;  %v2527_v29 = vpack.c.bf16 %v1726_v14, %v1518_v32  ;;  %v1915_v47 = vxor.u32 2147483648, %v1914_v48  ;;  %vm1833_vm12 = vcmp.lt.s32.totalorder %v3946_v4, 0 }
 0x356   : > { %v2122_v44 = vmul.f32 %v2121_v7, %v2119_v57  ;;  %v2019_v58 = vxor.u32 2147483648, %v2018_v59  ;;  %vm1937_vm6 = vcmp.lt.s32.totalorder %v3961_v24, 0  ;;  %vm2041_vm3 = vcmp.lt.s32.totalorder %v4011_v19, 0 }
 0x357   : > { %v2211_v60 = vclz %v2506_v50  ;;  %2528 = vmatpush1.bf16.msra.mxu0 %v2527_v29  ;;  %v1916_v51 = vsel %vm1833_vm12, %v1915_v47, %v1914_v48  ;;  %v2199_v18 = vadd.s32 %v4310_v52, %v4322_v34  ;;  %v4640_v35 = vand.u32 2147483647, %v3946_v4 }
 0x358   : > { %v2123_v21 = vxor.u32 2147483648, %v2122_v44  ;;  %v2020_v33 = vsel %vm1937_vm6, %v2019_v58, %v2018_v59  ;;  %v4643_v36 = vand.u32 2147483647, %v3961_v24  ;;  %v4646_v5 = vand.u32 2147483647, %v4011_v19 }
 0x359   : > { %v2507_v63 = vadd.s32 4294967294, %v2211_v60  ;;  %vm4376_vm8 = vcmp.le.f32.partialorder %v4640_v35, 0.7853982  ;;  %v2125_v9 = vsub.s32 4, %v4264_v28  ;;  %v2021_v10 = vsub.s32 4, %v4163_v27 }
 0x35a   : > { %vm4382_vm11 = vcmp.le.f32.partialorder %v4643_v36, 0.7853982  ;;  %v2124_v53 = vsel %vm2041_vm3, %v2123_v21, %v2122_v44  ;;  %v1919_v52 = vsel %vm4376_vm8, %v3946_v4, %v1916_v51  ;;  %vm4396_vm7 = vcmp.le.f32.partialorder %v4646_v5, 0.7853982 }
 0x35b   : > { %vm2508_vm0 = vcmp.lt.s32.totalorder %v2507_v63, 0  ;;  %v2023_v45 = vsel %vm4382_vm11, %v3961_v24, %v2020_v33  ;;  %v2127_v49 = vsel %vm4396_vm7, %v4011_v19, %v2124_v53  ;;  %2710 = vcosq.f32 %v1919_v52 }
 0x35c   : > { %v2214_v56 = vsel %vm2508_vm0, 0, %v2507_v63  ;;  %2712 = vcosq.f32 %v2023_v45  ;;  %v1917_v13 = vsub.s32 4, %v4100_v42  ;;  %v2126_v17 = vsel %vm2041_vm3, %v2125_v9, %v4264_v28 }
 0x35d   : > { %v2215_v43 = vsub.s32 32, %v2214_v56  ;;  %v2219_v23 = vsub.s32 4294967266, %v2214_v56  ;;  %v2216_v34 = vshll.u32 %v2207_v2, %v2214_v56  ;;  %2714 = vcosq.f32 %v2127_v49 }
 0x35e   : > { %2716 = vsinq.f32 %v2127_v49  ;;  %v2229_v26 = vsub.s32 4, %v4349_v8  ;;  %v2022_v6 = vsel %vm1937_vm6, %v2021_v10, %v4163_v27  ;;  %v1918_v1 = vsel %vm1833_vm12, %v1917_v13, %v4100_v42 }
 0x35f   : > { %v2217_v54 = vshrl.u32 %v2199_v18, %v2215_v43  ;;  %v2220_v39 = vadd.s32 127, %v2219_v23  ;;  %2718 = vsinq.f32 %v2023_v45  ;;  %v2128_v46 = vsel %vm4396_vm7, 0, %v2126_v17 }
 0x360   : > { %2720 = vsinq.f32 %v1919_v52  ;;  %vm2145_vm9 = vcmp.lt.s32.totalorder %v4153_v3, 0  ;;  %vm4421_vm10 = vcmp.le.f32.partialorder %v2143_v22, 0.7853982  ;;  %v2024_v27 = vsel %vm4382_vm11, 0, %v2022_v6 }
 0x361   : > { %v2218_v15 = vor.u32 %v2217_v54, %v2216_v34  ;;  %v2221_v25 = vshll.u32 %v2220_v39, 23  ;;  %v2230_v55 = vsel %vm2145_vm9, %v2229_v26, %v4349_v8  ;;  %v1920_v42 = vsel %vm4376_vm8, 0, %v1918_v1 }
 0x362   : > { %v2132_v31 = vadd.s32 3, %v2128_v46  ;;  %v2028_v12 = vadd.s32 3, %v2024_v27  ;;  %v2232_v40 = vsel %vm4421_vm10, 0, %v2230_v55  ;;  %v1924_v7 = vadd.s32 3, %v1920_v42 }
 0x363   : > { %v2222_v11 = vor.u32 4788187, %v2221_v25  ;;  %v2225_v38 = vcvt.s32.f32 %v2218_v15  ;;  %v2236_v14 = vadd.s32 3, %v2232_v40  ;;  %vm2131_vm7 = vweird.f32 %v4011_v19  ;;  %v2247_v19 = vld [vmem:[%s4500_s5] sm:$0xf] }
 0x364   : > { %v2133_v59 = vand.u32 3, %v2132_v31  ;;  %v2029_v50 = vand.u32 3, %v2028_v12  ;;  %v1925_v58 = vand.u32 3, %v1924_v7 }
 0x365   : > { %v2223_v41 = vand.u32 2147483647, %v2222_v11  ;;  %v2711_v61 = vpop.eup %2710  ;;  %v2237_v51 = vand.u32 3, %v2236_v14 }
 0x366   : > { %v2713_v57 = vpop.eup %2712  ;;  %v1931_v21 = vxor.u32 2147483648, %v2711_v61  ;;  %vm2135_vm1 = vcmp.eq.s32.totalorder %v2133_v59, 0  ;;  %vm2138_vm14 = vcmp.eq.s32.totalorder %v2133_v59, 2  ;;  %vm2031_vm2 = vcmp.eq.s32.totalorder %v2029_v50, 0 }
 0x367   : > { %v2226_v62 = vmul.f32 %v2225_v38, %v2223_v41  ;;  %v2715_v22 = vpop.eup %2714  ;;  %v2035_v47 = vxor.u32 2147483648, %v2713_v57  ;;  %vm2034_vm4 = vcmp.eq.s32.totalorder %v2029_v50, 2  ;;  %vm1927_vm5 = vcmp.eq.s32.totalorder %v1925_v58, 0 }
 0x368   : > { %v2717_v48 = vpop.eup %2716  ;;  %v2139_v44 = vxor.u32 2147483648, %v2715_v22  ;;  %vm1930_vm15 = vcmp.eq.s32.totalorder %v1925_v58, 2  ;;  %vm2134_vm12 = vcmp.lt.s32.totalorder %v2133_v59, 2  ;;  %vm2030_vm0 = vcmp.lt.s32.totalorder %v2029_v50, 2 }
 0x369   : > { %v2227_v0 = vxor.u32 2147483648, %v2226_v62  ;;  %v2719_v8 = vpop.eup %2718  ;;  %v2136_v29 = vxor.u32 2147483648, %v2717_v48  ;;  %vm2242_vm6 = vcmp.eq.s32.totalorder %v2237_v51, 2  ;;  %vm2239_vm3 = vcmp.eq.s32.totalorder %v2237_v51, 0 }
 0x36a   : > { %v2721_v32 = vpop.eup %2720  ;;  %v2032_v60 = vxor.u32 2147483648, %v2719_v8  ;;  %v2140_v33 = vsel %vm2138_vm14, %v2139_v44, %v2717_v48  ;;  %v2036_v23 = vsel %vm2034_vm4, %v2035_v47, %v2719_v8  ;;  %vm1926_vm8 = vcmp.lt.s32.totalorder %v1925_v58, 2 }
 0x36b   : > { %v2228_v2 = vsel %vm2145_vm9, %v2227_v0, %v2226_v62  ;;  %v1928_v63 = vxor.u32 2147483648, %v2721_v32  ;;  %v2137_v56 = vsel %vm2135_vm1, %v2715_v22, %v2136_v29  ;;  %v1932_v16 = vsel %vm1930_vm15, %v1931_v21, %v2721_v32 }
 0x36c   : > { %v2231_v37 = vsel %vm4421_vm10, %v4153_v3, %v2228_v2  ;;  %v2033_v43 = vsel %vm2031_vm2, %v2713_v57, %v2032_v60  ;;  %v2141_v52 = vsel %vm2134_vm12, %v2137_v56, %v2140_v33  ;;  %vm2238_vm11 = vcmp.lt.s32.totalorder %v2237_v51, 2 }
 0x36d   : > { %2722 = vcosq.f32 %v2231_v37  ;;  %v1929_v36 = vsel %vm1927_vm5, %v2711_v61, %v1928_v63  ;;  %v2037_v34 = vsel %vm2030_vm0, %v2033_v43, %v2036_v23  ;;  %vm2027_vm9 = vweird.f32 %v3961_v24  ;;  %v2252_v24 = vpop.permute.xlu0 %2251 }
 0x36e   : > { %2724 = vsinq.f32 %v2231_v37  ;;  %v1933_v45 = vsel %vm1926_vm8, %v1929_v36, %v1932_v16  ;;  %vm2235_vm10 = vweird.f32 %v4153_v3  ;;  %v2142_v20 = vsel %vm2131_vm7, nan, %v2141_v52 }
 0x36f   : > { %v2038_v49 = vsel %vm2027_vm9, nan, %v2037_v34  ;;  %vm1923_vm1 = vweird.f32 %v3946_v4 }
 0x370   : > { %v1934_v9 = vsel %vm1923_vm1, nan, %v1933_v45 }
 0x371   : > { %v2531_v11 = vpack.c.bf16 %v2142_v20, %v1934_v9 }
 0x377   : > { %v2723_v18 = vpop.eup %2722 }
 0x378   : > { %v2725_v35 = vpop.eup %2724  ;;  %v2243_v30 = vxor.u32 2147483648, %v2723_v18 }
 0x379   : > { %v2240_v53 = vxor.u32 2147483648, %v2725_v35 }
 0x37a   : > { %v2244_v54 = vsel %vm2242_vm6, %v2243_v30, %v2725_v35 }
 0x37b   : > { %v2241_v39 = vsel %vm2239_vm3, %v2723_v18, %v2240_v53 }
 0x37c   : > { %v2245_v5 = vsel %vm2238_vm11, %v2241_v39, %v2244_v54 }
 0x37d   : > { %v2246_v15 = vsel %vm2235_vm10, nan, %v2245_v5 }
 0x37e   : > { %v2529_v25 = vpack.c.bf16 %v2246_v15, %v2038_v49 }
 0x380   : > { %2530 = vmatprep.subr.bf16.mxu0 %v2529_v25 }
 0x381   : > { %2532 = vmatpush1.bf16.msra.mxu0 %v2531_v11 }
 0x384   : > { %2509 = vmatmul.mubr.msk.f32.vlgmr.msra.gmra.mrb[8].mxu0 %vm1313_vm13, %v2247_v19 }
 0x457   : > { %v2323_v3 = vpop.f32.mrb[8].mxu0 }
 0x458   : > { %v2324_v10 = vadd.f32 %v2323_v3, %v2252_v24  ;;  %v2325_v13 = vpop.f32.mrb[9].mxu0 }
 0x459   : > { %v2326_v4 = vadd.f32 %v2325_v13, %v2252_v24 }
 0x45b   : > { %v2330_v41 = vcombine.low %v2324_v10, %v2326_v4 }
 0x45d   : > { %2332 = vst [vmem:[%s296_s21] sm:$0xff] %v2330_v41 }
 0x45e   : > { %2739 = shalt.err (!%p2736_p5)
}
 0x45f   : > { %s2740_s16 = scalar_lea.hbm %s4448_s30, 128  ;;  %s2744_s19 = scalar_lea.hbm %s4502_s7, 256 }
 0x460   : > { %p2741_p6 = scmp.ne.s32.totalorder %s4448_s30, %s2740_s16  ;;  %p2745_p10 = scmp.lt.u32.totalorder %s4448_s30, %s4502_s7 }
 0x461   : > { %p2746_p11 = scmp.lt.u32.totalorder %s2744_s19, %s2740_s16  ;;  %p2748_p13 = scmp.lt.u32.totalorder %s2740_s16, %s4448_s30 }
 0x462   : > { %p2742_p7 = pnand %p2741_p6, %p2895_p4 }
 0x463   : > { %p2747_p12 = por %p2746_p11, %p2745_p10 }
 0x464   : > { %p2743_p9 = pneg %p2742_p7 }
 0x465   : > { %p2749_p0 = por %p2748_p13, %p2747_p12 }
 0x467   : > { %p2750_p1 = pnand %p2749_p0, %p2743_p9 }
 0x469   : > { %2753 = shalt.err (!%p2750_p1)
}
 0x46a   : > { %2597 = dma.vmem_to_hbm [thread:$0]  (%p2895_p4), %s4450_s20, 128, %s4448_s30, %s2334_s8  }
 0x46b PF: > { %p2603_p2 = scmp.ge.s32.totalorder %s2804_s29, 2  ;;  %s2362_s23 = sand.u32 1, %s2784_s24  }
 0x46c   : > { %s2363_s10 = scalar_lea.sflag [#allocation3], %s2362_s23 }
 0x46d   : > { %p2600_p3 = pnand %p2603_p2, %p2902_p8 }
 0x46f   : > { %2779 = dma.done.wait (!%p2600_p3), %s2363_s10, 128  }
 0x470   : > { %2781 = vsyncadd (!%p2600_p3), %s2363_s10, 4294967168  ;;  %s20_s29 = sadd.s32 1, %s2804_s29   ;;  %s4651_s24 = smov %s2788_s25 }
 0x471   : > { %p17_p5 = scmp.ge.s32.totalorder %s20_s29, 4   ;;  %s4652_s25 = smov %s2792_s26 }
 0x472   : > { %s4653_s26 = smov %s2908_s14  ;;  %s4654_s27 = smov %s2800_s28 }
 0x473   : > { %s4655_s28 = smov %s4657_s9  ;;  %19 = sbr.rel (!%p17_p5) target bundleno = 4 (0x4), region = 83 }
 0x47a   :  { %2368 = vsyncpa [#allocation3], 1 }
 0x47b   :  { %2370 = vsyncpa [#allocation3 + $0x1], 1 }

</bundles_post_ra>
